<compile_context>
chip_gen: v6e
topology: v6e:2x2x1
jax: 0.10.0
libtpu: 0.0.40
codegen_flags: <defaults>
</compile_context>

<pallas_src>
import functools

import jax
import jax.numpy as jnp
from jax.experimental import pallas as pl
from jax.experimental.pallas import tpu as pltpu


_INV_SQRT2 = 0.7071067811865476


def _round_up(v, m):
    return (v + m - 1) // m * m


def _gelu_exact(s):
    # Exact (erf-based) GELU matching nn.GELU() default.  erf via the A&S
    # 7.1.26 rational approximation (|err| < 1.5e-7).  exp and the reciprocal
    # both go to the EUP slot, leaving the VALU free for the polynomial fmuls.
    z = s * _INV_SQRT2
    sgn = jnp.where(z >= 0.0, 1.0, -1.0)
    az = jnp.abs(z)
    t = pl.reciprocal(1.0 + 0.3275911 * az, approx=True)
    poly = t * (0.254829592 + t * (-0.284496736 + t * (1.421413741
           + t * (-1.453152027 + t * 1.061405429))))
    erf = sgn * (1.0 - poly * jnp.exp(-az * az))
    return 0.5 * s * (1.0 + erf)


# ----------------------------- Pallas kernels -------------------------------

def _conv_fused_kernel(wp, w_ref, x_ref, b_ref, fft_ref, o_ref):
    """One batch image per grid step (wide flat layout, column index h*Wp+w).

    w_ref  : (25, Cp, Cp) bf16  folded 5x5 taps, w_ref[dh*5+dw] = W[:, :, dh, dw]
    x_ref  : (1, Cp, Lin) f32   zero-padded image, rows flattened with Wp=W+4
    b_ref  : (Cp, 1)      f32   summed biases
    fft_ref: (1, Cp, M)   f32   FFC-branch output, same wide flat layout
    o_ref  : (1, Cp, M)   f32   GELU(conv + bias + fft + residual)
    """
    m = o_ref.shape[-1]
    xs = x_ref[0]                                          # (Cp, Lin), resident
    # Epilogue terms first: bias + FFC branch + residual (exact f32 center tap).
    acc = b_ref[...] + fft_ref[0] + xs[:, 2 * wp + 2: 2 * wp + 2 + m]
    # In-VMEM im2col: 25 lane-offset slices of the resident slab, one MXU
    # matmul per tap, accumulated in f32.
    for t in range(25):
        off = (t // 5) * wp + (t % 5)
        sh = xs[:, off: off + m].astype(jnp.bfloat16)
        acc = acc + jnp.dot(w_ref[t], sh, preferred_element_type=jnp.float32)
    o_ref[0] = _gelu_exact(acc)


def _gemm_left_kernel(w_ref, a_ref, o_ref):
    """No-bias left GEMM for the spectral 1x1 conv: W(2C,2C) @ A_tile(2C,tcol)."""
    o_ref[0] = jnp.dot(w_ref[...], a_ref[0], preferred_element_type=jnp.float32)


# ----------------------------- Pallas wrappers -------------------------------

def _pick_col_tile(m):
    for t in (1024, 512, 256, 128):
        if t <= m and m % t == 0:
            return t
    return m


def _vmem_limit(stream_bytes, resident_bytes):
    # Double-buffered streamed tiles + resident weights/temporaries + slack;
    # floor 32 MiB (above every default scoped limit), cap 64 MiB (v7x physical).
    need = 2 * stream_bytes + resident_bytes + (8 << 20)
    return int(min(max(need, 32 << 20), 64 << 20))


def pallas_conv_fused(w_taps, xflat, bias, fft_wide, *, wp):
    _, cp, _ = w_taps.shape
    b, _, l_in = xflat.shape
    m_pad = fft_wide.shape[-1]
    stream = cp * l_in * 4 + 2 * cp * m_pad * 4            # x + fft + out / step
    resident = w_taps.size * 2 + bias.size * 4 + 4 * cp * m_pad * 4
    cost = pl.CostEstimate(
        flops=2 * b * 25 * cp * cp * m_pad + 20 * b * cp * m_pad,
        transcendentals=2 * b * cp * m_pad,
        bytes_accessed=(xflat.size + fft_wide.size + b * cp * m_pad
                        + bias.size) * 4 + w_taps.size * 2)
    return pl.pallas_call(
        functools.partial(_conv_fused_kernel, wp),
        out_shape=jax.ShapeDtypeStruct((b, cp, m_pad), jnp.float32),
        grid=(b,),
        in_specs=[
            pl.BlockSpec((25, cp, cp), lambda bi: (0, 0, 0)),   # weights resident
            pl.BlockSpec((1, cp, l_in), lambda bi: (bi, 0, 0)),  # padded image
            pl.BlockSpec((cp, 1), lambda bi: (0, 0)),
            pl.BlockSpec((1, cp, m_pad), lambda bi: (bi, 0, 0)),
        ],
        out_specs=pl.BlockSpec((1, cp, m_pad), lambda bi: (bi, 0, 0)),
        compiler_params=pltpu.CompilerParams(
            dimension_semantics=("parallel",),
            vmem_limit_bytes=_vmem_limit(stream, resident)),
        cost_estimate=cost,
    )(w_taps, xflat, bias, fft_wide)


def pallas_spectral_gemm(wmat, a):
    """out[b] = Wfft(2C,2C) @ A[b](2C,M) in f32; no bias (FFC conv bias=False)."""
    n, k = wmat.shape
    b, _, m = a.shape
    tcol = _pick_col_tile(m)
    stream = (k + n) * tcol * 4
    resident = wmat.size * 4
    cost = pl.CostEstimate(
        flops=2 * b * n * k * m, transcendentals=0,
        bytes_accessed=(wmat.size + a.size + b * n * m) * 4)
    return pl.pallas_call(
        _gemm_left_kernel,
        out_shape=jax.ShapeDtypeStruct((b, n, m), jnp.float32),
        grid=(b, m // tcol),
        in_specs=[
            pl.BlockSpec((n, k), lambda bi, j: (0, 0)),
            pl.BlockSpec((1, k, tcol), lambda bi, j: (bi, 0, j)),
        ],
        out_specs=pl.BlockSpec((1, n, tcol), lambda bi, j: (bi, 0, j)),
        compiler_params=pltpu.CompilerParams(
            dimension_semantics=("parallel", "parallel"),
            vmem_limit_bytes=_vmem_limit(stream, resident)),
        cost_estimate=cost,
    )(wmat, a)


# ----------------------------- JAX glue --------------------------------------

@jax.jit
def dlk_conv_act(x, params):
    b, c, h, w = x.shape
    cp = _round_up(c, 8)                    # sublane-aligned channel count
    hp, wp = h + 4, w + 4
    m_wide = h * wp                         # wide flat output length (j = h*Wp+w)
    m_pad = _round_up(m_wide, 128)          # lane-dense output columns
    l_in = _round_up(max(hp * wp, m_pad + 4 * wp + 4), 128)

    # --- fold 3x3 + 5x5 + 1x1 into ONE 5x5 conv (same math, fewer FLOPs) ------
    w_fold = (params["w5"]
              + jnp.pad(params["w3"], ((0, 0), (0, 0), (1, 1), (1, 1)))
              + jnp.pad(params["w1"], ((0, 0), (0, 0), (2, 2), (2, 2))))
    w_fold = jnp.pad(w_fold, ((0, cp - c), (0, cp - c), (0, 0), (0, 0)))
    # (Cp, Cp, 5, 5) -> (25, Cp, Cp): w_taps[dh*5+dw] = W[:, :, dh, dw]
    w_taps = jnp.transpose(w_fold, (2, 3, 0, 1)).reshape(25, cp, cp)
    w_taps = w_taps.astype(jnp.bfloat16)
    bias = jnp.pad(params["b3"] + params["b5"] + params["b1"],
                   (0, cp - c)).reshape(cp, 1)

    # --- zero-padded, row-flattened input (f32; also supplies exact residual) --
    xpad = jnp.pad(x, ((0, 0), (0, cp - c), (2, 2), (2, 2)))       # (B,Cp,Hp,Wp)
    xflat = xpad.reshape(b, cp, hp * wp)
    xflat = jnp.pad(xflat, ((0, 0), (0, 0), (0, l_in - hp * wp)))  # (B,Cp,Lin)

    # --- FFC branch (FFTs stay in XLA; spectral 1x1 conv in Pallas, f32) -------
    ff = jnp.fft.rfft2(x, axes=(-2, -1))                           # (B,C,H,Wr)
    wr = ff.shape[-1]
    m_spec = h * wr
    m_spec_pad = _round_up(m_spec, 128)
    spec = jnp.stack([ff.real, ff.imag], axis=2).reshape(b, 2 * c, m_spec)
    spec = jnp.pad(spec, ((0, 0), (0, 0), (0, m_spec_pad - m_spec)))
    wfft = params["wfft"][:, :, 0, 0].astype(jnp.float32)          # (2C, 2C)
    spec_out = pallas_spectral_gemm(wfft, spec)[:, :, :m_spec]     # (B,2C,H*Wr)
    spec_out = spec_out.reshape(b, c, 2, h, wr)
    fft_out = jnp.fft.irfft2(spec_out[:, :, 0] + 1j * spec_out[:, :, 1],
                             s=(h, w), axes=(-2, -1)).astype(jnp.float32)

    # FFC output mapped to the same wide flat layout as the conv output.
    fft_wide = jnp.pad(fft_out, ((0, 0), (0, cp - c), (0, 0), (0, wp - w)))
    fft_wide = fft_wide.reshape(b, cp, m_wide)
    fft_wide = jnp.pad(fft_wide, ((0, 0), (0, 0), (0, m_pad - m_wide)))

    # --- fused conv GEMM + bias + FFT add + residual add + GELU ---------------
    out_wide = pallas_conv_fused(w_taps, xflat, bias, fft_wide, wp=wp)
    out = out_wide[:, :c, :m_wide].reshape(b, c, h, wp)[..., :w]
    return out


def init_params(key, c):
    ks = jax.random.split(key, 7)
    s = 0.05
    return {
        "w3": jax.random.normal(ks[0], (c, c, 3, 3), jnp.float32) * s,
        "b3": jax.random.normal(ks[1], (c,), jnp.float32) * s,
        "w5": jax.random.normal(ks[2], (c, c, 5, 5), jnp.float32) * s,
        "b5": jax.random.normal(ks[3], (c,), jnp.float32) * s,
        "w1": jax.random.normal(ks[4], (c, c, 1, 1), jnp.float32) * s,
        "b1": jax.random.normal(ks[5], (c,), jnp.float32) * s,
        "wfft": jax.random.normal(ks[6], (2 * c, 2 * c, 1, 1), jnp.float32) * s,
    }


def reference(x, params):
    b, c, h, w = x.shape
    dn = ("NCHW", "OIHW", "NCHW")
    conv = lambda t, wt, p: jax.lax.conv_general_dilated(
        t, wt, (1, 1), [(p, p), (p, p)], dimension_numbers=dn)
    r3 = conv(x, params["w3"], 1) + params["b3"][None, :, None, None]
    r5 = conv(x, params["w5"], 2) + params["b5"][None, :, None, None]
    r1 = conv(x, params["w1"], 0) + params["b1"][None, :, None, None]
    ff = jnp.fft.rfft2(x, axes=(-2, -1))
    wr = ff.shape[-1]
    ffted = jnp.stack([ff.real, ff.imag], -1)
    ffted = jnp.transpose(ffted, (0, 1, 4, 2, 3)).reshape(b, 2 * c, h, wr)
    ffted = conv(ffted, params["wfft"], 0)
    ffted = ffted.reshape(b, c, 2, h, wr)
    fft_out = jnp.fft.irfft2(ffted[:, :, 0] + 1j * ffted[:, :, 1],
                             s=(h, w), axes=(-2, -1))
    return jax.nn.gelu(r3 + r5 + r1 + fft_out + x, approximate=False)


if __name__ == "__main__":
    key = jax.random.PRNGKey(0)
    kx, kp = jax.random.split(key)
    B, C, H, W = 2, 4, 16, 16          # out_channels == in_channels (residual)
    x = jax.random.normal(kx, (B, C, H, W), jnp.float32)
    params = init_params(kp, C)

    out = dlk_conv_act(x, params)
    jax.block_until_ready(out)

    ref = reference(x, params)
    err = float(jnp.max(jnp.abs(out - ref)))
    assert out.shape == (B, C, H, W)
    assert bool(jnp.all(jnp.isfinite(out)))
    assert err < 5e-2, f"max abs err {err}"
    print("KERNEL_OK")
</pallas_src>

<mosaic_0001>
module attributes {stable_mosaic.version = 11 : i64} {
  func.func @_gemm_left_kernel(%arg0: i32, %arg1: i32, %arg2: memref<8x8xf32, #tpu.memory_space<vmem>>, %arg3: memref<1x8x256xf32, #tpu.memory_space<vmem>>, %arg4: memref<1x8x256xf32, #tpu.memory_space<vmem>>) attributes {dimension_semantics = [#tpu.dimension_semantics<parallel>, #tpu.dimension_semantics<parallel>], iteration_bounds = array<i64: 2, 1>, scalar_prefetch = 0 : i64, scratch_operands = 0 : i64, tpu.core_type = #tpu.core_type<tc>, window_params = [{pipeline_mode = #tpu.pipeline_mode<synchronous>, transform_indices = @transform_0, window_bounds = array<i64: 8, 8>}, {transform_indices = @transform_1, window_bounds = array<i64: 1, 8, 256>}, {transform_indices = @transform_2, window_bounds = array<i64: 1, 8, 256>}]} {
    %c0 = arith.constant 0 : index
    %c0_0 = arith.constant 0 : index
    %0 = vector.load %arg2[%c0, %c0_0] : memref<8x8xf32, #tpu.memory_space<vmem>>, vector<8x8xf32>
    %c0_1 = arith.constant 0 : index
    %c0_2 = arith.constant 0 : index
    %c0_3 = arith.constant 0 : index
    %1 = vector.load %arg3[%c0_1, %c0_2, %c0_3] : memref<1x8x256xf32, #tpu.memory_space<vmem>>, vector<1x8x256xf32>
    %2 = vector.shape_cast %1 : vector<1x8x256xf32> to vector<8x256xf32>
    %cst = arith.constant dense<0.000000e+00> : vector<8x256xf32>
    %3 = tpu.matmul %0, %2, %cst {dimension_numbers = #tpu.dot_dimension_numbers<[1], [0], [0], [1], [0, 0, 1, 1], [], []>} : vector<8x8xf32>, vector<8x256xf32>, vector<8x256xf32> -> vector<8x256xf32>
    %c0_4 = arith.constant 0 : index
    %c0_5 = arith.constant 0 : index
    %c0_6 = arith.constant 0 : index
    %4 = vector.load %arg4[%c0_4, %c0_5, %c0_6] : memref<1x8x256xf32, #tpu.memory_space<vmem>>, vector<1x8x256xf32>
    %5 = vector.shape_cast %4 : vector<1x8x256xf32> to vector<8x256xf32>
    %6 = vector.shape_cast %3 : vector<8x256xf32> to vector<1x8x256xf32>
    tpu.vector_store %arg4[%c0_4, %c0_5, %c0_6], %6 {strides = array<i32>} : memref<1x8x256xf32, #tpu.memory_space<vmem>>, vector<1x8x256xf32>,
    return
  }
  func.func @transform_0(%arg0: i32, %arg1: i32) -> (i32, i32) {
    %c0_i32 = arith.constant 0 : i32
    %c0_i32_0 = arith.constant 0 : i32
    %c0_i32_1 = arith.constant 0 : i32
    return %c0_i32, %c0_i32_0 : i32, i32
  }
  func.func @transform_1(%arg0: i32, %arg1: i32) -> (i32, i32, i32) {
    %c0_i32 = arith.constant 0 : i32
    %c0_i32_0 = arith.constant 0 : i32
    return %arg0, %c0_i32, %arg1 : i32, i32, i32
  }
  func.func @transform_2(%arg0: i32, %arg1: i32) -> (i32, i32, i32) {
    %c0_i32 = arith.constant 0 : i32
    %c0_i32_0 = arith.constant 0 : i32
    return %arg0, %c0_i32, %arg1 : i32, i32, i32
  }
}

module attributes {stable_mosaic.version = 11 : i64} {
  func.func @_conv_fused_kernel(%arg0: i32, %arg1: memref<25x8x8xbf16, #tpu.memory_space<vmem>>, %arg2: memref<1x8x512xf32, #tpu.memory_space<vmem>>, %arg3: memref<8x1xf32, #tpu.memory_space<vmem>>, %arg4: memref<1x8x384xf32, #tpu.memory_space<vmem>>, %arg5: memref<1x8x384xf32, #tpu.memory_space<vmem>>) attributes {dimension_semantics = [#tpu.dimension_semantics<parallel>], iteration_bounds = array<i64: 2>, scalar_prefetch = 0 : i64, scratch_operands = 0 : i64, tpu.core_type = #tpu.core_type<tc>, window_params = [{pipeline_mode = #tpu.pipeline_mode<synchronous>, transform_indices = @transform_0, window_bounds = array<i64: 25, 8, 8>}, {transform_indices = @transform_1, window_bounds = array<i64: 1, 8, 512>}, {pipeline_mode = #tpu.pipeline_mode<synchronous>, transform_indices = @transform_2, window_bounds = array<i64: 8, 1>}, {transform_indices = @transform_3, window_bounds = array<i64: 1, 8, 384>}, {transform_indices = @transform_4, window_bounds = array<i64: 1, 8, 384>}]} {
    %c0 = arith.constant 0 : index
    %c0_0 = arith.constant 0 : index
    %c0_1 = arith.constant 0 : index
    %0 = vector.load %arg2[%c0, %c0_0, %c0_1] : memref<1x8x512xf32, #tpu.memory_space<vmem>>, vector<1x8x512xf32>
    %1 = vector.shape_cast %0 : vector<1x8x512xf32> to vector<8x512xf32>
    %c0_2 = arith.constant 0 : index
    %c0_3 = arith.constant 0 : index
    %2 = vector.load %arg3[%c0_2, %c0_3] : memref<8x1xf32, #tpu.memory_space<vmem>>, vector<8x1xf32>
    %c0_4 = arith.constant 0 : index
    %c0_5 = arith.constant 0 : index
    %c0_6 = arith.constant 0 : index
    %3 = vector.load %arg4[%c0_4, %c0_5, %c0_6] : memref<1x8x384xf32, #tpu.memory_space<vmem>>, vector<1x8x384xf32>
    %4 = vector.shape_cast %3 : vector<1x8x384xf32> to vector<8x384xf32>
    %5 = vector.broadcast %2 : vector<8x1xf32> to vector<8x384xf32>
    %6 = arith.addf %5, %4 : vector<8x384xf32>
    %7 = vector.extract_strided_slice %1 {offsets = [0, 42], sizes = [8, 384], strides = [1, 1]} : vector<8x512xf32> to vector<8x384xf32>
    %8 = arith.addf %6, %7 : vector<8x384xf32>
    %9 = vector.extract_strided_slice %1 {offsets = [0, 0], sizes = [8, 384], strides = [1, 1]} : vector<8x512xf32> to vector<8x384xf32>
    %10 = arith.truncf %9 : vector<8x384xf32> to vector<8x384xbf16>
    %c0_7 = arith.constant 0 : index
    %c0_8 = arith.constant 0 : index
    %c0_9 = arith.constant 0 : index
    %11 = vector.load %arg1[%c0_7, %c0_8, %c0_9] : memref<25x8x8xbf16, #tpu.memory_space<vmem>>, vector<1x8x8xbf16>
    %12 = vector.shape_cast %11 : vector<1x8x8xbf16> to vector<8x8xbf16>
    %cst = arith.constant dense<0.000000e+00> : vector<8x384xf32>
    %13 = tpu.matmul %12, %10, %cst {dimension_numbers = #tpu.dot_dimension_numbers<[1], [0], [0], [1], [0, 0, 1, 1], [], []>} : vector<8x8xbf16>, vector<8x384xbf16>, vector<8x384xf32> -> vector<8x384xf32>
    %14 = arith.addf %8, %13 : vector<8x384xf32>
    %15 = vector.extract_strided_slice %1 {offsets = [0, 1], sizes = [8, 384], strides = [1, 1]} : vector<8x512xf32> to vector<8x384xf32>
    %16 = arith.truncf %15 : vector<8x384xf32> to vector<8x384xbf16>
    %c1 = arith.constant 1 : index
    %c0_10 = arith.constant 0 : index
    %c0_11 = arith.constant 0 : index
    %17 = vector.load %arg1[%c1, %c0_10, %c0_11] : memref<25x8x8xbf16, #tpu.memory_space<vmem>>, vector<1x8x8xbf16>
    %18 = vector.shape_cast %17 : vector<1x8x8xbf16> to vector<8x8xbf16>
    %cst_12 = arith.constant dense<0.000000e+00> : vector<8x384xf32>
    %19 = tpu.matmul %18, %16, %cst_12 {dimension_numbers = #tpu.dot_dimension_numbers<[1], [0], [0], [1], [0, 0, 1, 1], [], []>} : vector<8x8xbf16>, vector<8x384xbf16>, vector<8x384xf32> -> vector<8x384xf32>
    %20 = arith.addf %14, %19 : vector<8x384xf32>
    %21 = vector.extract_strided_slice %1 {offsets = [0, 2], sizes = [8, 384], strides = [1, 1]} : vector<8x512xf32> to vector<8x384xf32>
    %22 = arith.truncf %21 : vector<8x384xf32> to vector<8x384xbf16>
    %c2 = arith.constant 2 : index
    %c0_13 = arith.constant 0 : index
    %c0_14 = arith.constant 0 : index
    %23 = vector.load %arg1[%c2, %c0_13, %c0_14] : memref<25x8x8xbf16, #tpu.memory_space<vmem>>, vector<1x8x8xbf16>
    %24 = vector.shape_cast %23 : vector<1x8x8xbf16> to vector<8x8xbf16>
    %cst_15 = arith.constant dense<0.000000e+00> : vector<8x384xf32>
    %25 = tpu.matmul %24, %22, %cst_15 {dimension_numbers = #tpu.dot_dimension_numbers<[1], [0], [0], [1], [0, 0, 1, 1], [], []>} : vector<8x8xbf16>, vector<8x384xbf16>, vector<8x384xf32> -> vector<8x384xf32>
    %26 = arith.addf %20, %25 : vector<8x384xf32>
    %27 = vector.extract_strided_slice %1 {offsets = [0, 3], sizes = [8, 384], strides = [1, 1]} : vector<8x512xf32> to vector<8x384xf32>
    %28 = arith.truncf %27 : vector<8x384xf32> to vector<8x384xbf16>
    %c3 = arith.constant 3 : index
    %c0_16 = arith.constant 0 : index
    %c0_17 = arith.constant 0 : index
    %29 = vector.load %arg1[%c3, %c0_16, %c0_17] : memref<25x8x8xbf16, #tpu.memory_space<vmem>>, vector<1x8x8xbf16>
    %30 = vector.shape_cast %29 : vector<1x8x8xbf16> to vector<8x8xbf16>
    %cst_18 = arith.constant dense<0.000000e+00> : vector<8x384xf32>
    %31 = tpu.matmul %30, %28, %cst_18 {dimension_numbers = #tpu.dot_dimension_numbers<[1], [0], [0], [1], [0, 0, 1, 1], [], []>} : vector<8x8xbf16>, vector<8x384xbf16>, vector<8x384xf32> -> vector<8x384xf32>
    %32 = arith.addf %26, %31 : vector<8x384xf32>
    %33 = vector.extract_strided_slice %1 {offsets = [0, 4], sizes = [8, 384], strides = [1, 1]} : vector<8x512xf32> to vector<8x384xf32>
    %34 = arith.truncf %33 : vector<8x384xf32> to vector<8x384xbf16>
    %c4 = arith.constant 4 : index
    %c0_19 = arith.constant 0 : index
    %c0_20 = arith.constant 0 : index
    %35 = vector.load %arg1[%c4, %c0_19, %c0_20] : memref<25x8x8xbf16, #tpu.memory_space<vmem>>, vector<1x8x8xbf16>
    %36 = vector.shape_cast %35 : vector<1x8x8xbf16> to vector<8x8xbf16>
    %cst_21 = arith.constant dense<0.000000e+00> : vector<8x384xf32>
    %37 = tpu.matmul %36, %34, %cst_21 {dimension_numbers = #tpu.dot_dimension_numbers<[1], [0], [0], [1], [0, 0, 1, 1], [], []>} : vector<8x8xbf16>, vector<8x384xbf16>, vector<8x384xf32> -> vector<8x384xf32>
    %38 = arith.addf %32, %37 : vector<8x384xf32>
    %39 = vector.extract_strided_slice %1 {offsets = [0, 20], sizes = [8, 384], strides = [1, 1]} : vector<8x512xf32> to vector<8x384xf32>
    %40 = arith.truncf %39 : vector<8x384xf32> to vector<8x384xbf16>
    %c5 = arith.constant 5 : index
    %c0_22 = arith.constant 0 : index
    %c0_23 = arith.constant 0 : index
    %41 = vector.load %arg1[%c5, %c0_22, %c0_23] : memref<25x8x8xbf16, #tpu.memory_space<vmem>>, vector<1x8x8xbf16>
    %42 = vector.shape_cast %41 : vector<1x8x8xbf16> to vector<8x8xbf16>
    %cst_24 = arith.constant dense<0.000000e+00> : vector<8x384xf32>
    %43 = tpu.matmul %42, %40, %cst_24 {dimension_numbers = #tpu.dot_dimension_numbers<[1], [0], [0], [1], [0, 0, 1, 1], [], []>} : vector<8x8xbf16>, vector<8x384xbf16>, vector<8x384xf32> -> vector<8x384xf32>
    %44 = arith.addf %38, %43 : vector<8x384xf32>
    %45 = vector.extract_strided_slice %1 {offsets = [0, 21], sizes = [8, 384], strides = [1, 1]} : vector<8x512xf32> to vector<8x384xf32>
    %46 = arith.truncf %45 : vector<8x384xf32> to vector<8x384xbf16>
    %c6 = arith.constant 6 : index
    %c0_25 = arith.constant 0 : index
    %c0_26 = arith.constant 0 : index
    %47 = vector.load %arg1[%c6, %c0_25, %c0_26] : memref<25x8x8xbf16, #tpu.memory_space<vmem>>, vector<1x8x8xbf16>
    %48 = vector.shape_cast %47 : vector<1x8x8xbf16> to vector<8x8xbf16>
    %cst_27 = arith.constant dense<0.000000e+00> : vector<8x384xf32>
    %49 = tpu.matmul %48, %46, %cst_27 {dimension_numbers = #tpu.dot_dimension_numbers<[1], [0], [0], [1], [0, 0, 1, 1], [], []>} : vector<8x8xbf16>, vector<8x384xbf16>, vector<8x384xf32> -> vector<8x384xf32>
    %50 = arith.addf %44, %49 : vector<8x384xf32>
    %51 = vector.extract_strided_slice %1 {offsets = [0, 22], sizes = [8, 384], strides = [1, 1]} : vector<8x512xf32> to vector<8x384xf32>
    %52 = arith.truncf %51 : vector<8x384xf32> to vector<8x384xbf16>
    %c7 = arith.constant 7 : index
    %c0_28 = arith.constant 0 : index
    %c0_29 = arith.constant 0 : index
    %53 = vector.load %arg1[%c7, %c0_28, %c0_29] : memref<25x8x8xbf16, #tpu.memory_space<vmem>>, vector<1x8x8xbf16>
    %54 = vector.shape_cast %53 : vector<1x8x8xbf16> to vector<8x8xbf16>
    %cst_30 = arith.constant dense<0.000000e+00> : vector<8x384xf32>
    %55 = tpu.matmul %54, %52, %cst_30 {dimension_numbers = #tpu.dot_dimension_numbers<[1], [0], [0], [1], [0, 0, 1, 1], [], []>} : vector<8x8xbf16>, vector<8x384xbf16>, vector<8x384xf32> -> vector<8x384xf32>
    %56 = arith.addf %50, %55 : vector<8x384xf32>
    %57 = vector.extract_strided_slice %1 {offsets = [0, 23], sizes = [8, 384], strides = [1, 1]} : vector<8x512xf32> to vector<8x384xf32>
    %58 = arith.truncf %57 : vector<8x384xf32> to vector<8x384xbf16>
    %c8 = arith.constant 8 : index
    %c0_31 = arith.constant 0 : index
    %c0_32 = arith.constant 0 : index
    %59 = vector.load %arg1[%c8, %c0_31, %c0_32] : memref<25x8x8xbf16, #tpu.memory_space<vmem>>, vector<1x8x8xbf16>
    %60 = vector.shape_cast %59 : vector<1x8x8xbf16> to vector<8x8xbf16>
    %cst_33 = arith.constant dense<0.000000e+00> : vector<8x384xf32>
    %61 = tpu.matmul %60, %58, %cst_33 {dimension_numbers = #tpu.dot_dimension_numbers<[1], [0], [0], [1], [0, 0, 1, 1], [], []>} : vector<8x8xbf16>, vector<8x384xbf16>, vector<8x384xf32> -> vector<8x384xf32>
    %62 = arith.addf %56, %61 : vector<8x384xf32>
    %63 = vector.extract_strided_slice %1 {offsets = [0, 24], sizes = [8, 384], strides = [1, 1]} : vector<8x512xf32> to vector<8x384xf32>
    %64 = arith.truncf %63 : vector<8x384xf32> to vector<8x384xbf16>
    %c9 = arith.constant 9 : index
    %c0_34 = arith.constant 0 : index
    %c0_35 = arith.constant 0 : index
    %65 = vector.load %arg1[%c9, %c0_34, %c0_35] : memref<25x8x8xbf16, #tpu.memory_space<vmem>>, vector<1x8x8xbf16>
    %66 = vector.shape_cast %65 : vector<1x8x8xbf16> to vector<8x8xbf16>
    %cst_36 = arith.constant dense<0.000000e+00> : vector<8x384xf32>
    %67 = tpu.matmul %66, %64, %cst_36 {dimension_numbers = #tpu.dot_dimension_numbers<[1], [0], [0], [1], [0, 0, 1, 1], [], []>} : vector<8x8xbf16>, vector<8x384xbf16>, vector<8x384xf32> -> vector<8x384xf32>
    %68 = arith.addf %62, %67 : vector<8x384xf32>
    %69 = vector.extract_strided_slice %1 {offsets = [0, 40], sizes = [8, 384], strides = [1, 1]} : vector<8x512xf32> to vector<8x384xf32>
    %70 = arith.truncf %69 : vector<8x384xf32> to vector<8x384xbf16>
    %c10 = arith.constant 10 : index
    %c0_37 = arith.constant 0 : index
    %c0_38 = arith.constant 0 : index
    %71 = vector.load %arg1[%c10, %c0_37, %c0_38] : memref<25x8x8xbf16, #tpu.memory_space<vmem>>, vector<1x8x8xbf16>
    %72 = vector.shape_cast %71 : vector<1x8x8xbf16> to vector<8x8xbf16>
    %cst_39 = arith.constant dense<0.000000e+00> : vector<8x384xf32>
    %73 = tpu.matmul %72, %70, %cst_39 {dimension_numbers = #tpu.dot_dimension_numbers<[1], [0], [0], [1], [0, 0, 1, 1], [], []>} : vector<8x8xbf16>, vector<8x384xbf16>, vector<8x384xf32> -> vector<8x384xf32>
    %74 = arith.addf %68, %73 : vector<8x384xf32>
    %75 = vector.extract_strided_slice %1 {offsets = [0, 41], sizes = [8, 384], strides = [1, 1]} : vector<8x512xf32> to vector<8x384xf32>
    %76 = arith.truncf %75 : vector<8x384xf32> to vector<8x384xbf16>
    %c11 = arith.constant 11 : index
    %c0_40 = arith.constant 0 : index
    %c0_41 = arith.constant 0 : index
    %77 = vector.load %arg1[%c11, %c0_40, %c0_41] : memref<25x8x8xbf16, #tpu.memory_space<vmem>>, vector<1x8x8xbf16>
    %78 = vector.shape_cast %77 : vector<1x8x8xbf16> to vector<8x8xbf16>
    %cst_42 = arith.constant dense<0.000000e+00> : vector<8x384xf32>
    %79 = tpu.matmul %78, %76, %cst_42 {dimension_numbers = #tpu.dot_dimension_numbers<[1], [0], [0], [1], [0, 0, 1, 1], [], []>} : vector<8x8xbf16>, vector<8x384xbf16>, vector<8x384xf32> -> vector<8x384xf32>
    %80 = arith.addf %74, %79 : vector<8x384xf32>
    %81 = vector.extract_strided_slice %1 {offsets = [0, 42], sizes = [8, 384], strides = [1, 1]} : vector<8x512xf32> to vector<8x384xf32>
    %82 = arith.truncf %81 : vector<8x384xf32> to vector<8x384xbf16>
    %c12 = arith.constant 12 : index
    %c0_43 = arith.constant 0 : index
    %c0_44 = arith.constant 0 : index
    %83 = vector.load %arg1[%c12, %c0_43, %c0_44] : memref<25x8x8xbf16, #tpu.memory_space<vmem>>, vector<1x8x8xbf16>
    %84 = vector.shape_cast %83 : vector<1x8x8xbf16> to vector<8x8xbf16>
    %cst_45 = arith.constant dense<0.000000e+00> : vector<8x384xf32>
    %85 = tpu.matmul %84, %82, %cst_45 {dimension_numbers = #tpu.dot_dimension_numbers<[1], [0], [0], [1], [0, 0, 1, 1], [], []>} : vector<8x8xbf16>, vector<8x384xbf16>, vector<8x384xf32> -> vector<8x384xf32>
    %86 = arith.addf %80, %85 : vector<8x384xf32>
    %87 = vector.extract_strided_slice %1 {offsets = [0, 43], sizes = [8, 384], strides = [1, 1]} : vector<8x512xf32> to vector<8x384xf32>
    %88 = arith.truncf %87 : vector<8x384xf32> to vector<8x384xbf16>
    %c13 = arith.constant 13 : index
    %c0_46 = arith.constant 0 : index
    %c0_47 = arith.constant 0 : index
    %89 = vector.load %arg1[%c13, %c0_46, %c0_47] : memref<25x8x8xbf16, #tpu.memory_space<vmem>>, vector<1x8x8xbf16>
    %90 = vector.shape_cast %89 : vector<1x8x8xbf16> to vector<8x8xbf16>
    %cst_48 = arith.constant dense<0.000000e+00> : vector<8x384xf32>
    %91 = tpu.matmul %90, %88, %cst_48 {dimension_numbers = #tpu.dot_dimension_numbers<[1], [0], [0], [1], [0, 0, 1, 1], [], []>} : vector<8x8xbf16>, vector<8x384xbf16>, vector<8x384xf32> -> vector<8x384xf32>
    %92 = arith.addf %86, %91 : vector<8x384xf32>
    %93 = vector.extract_strided_slice %1 {offsets = [0, 44], sizes = [8, 384], strides = [1, 1]} : vector<8x512xf32> to vector<8x384xf32>
    %94 = arith.truncf %93 : vector<8x384xf32> to vector<8x384xbf16>
    %c14 = arith.constant 14 : index
    %c0_49 = arith.constant 0 : index
    %c0_50 = arith.constant 0 : index
    %95 = vector.load %arg1[%c14, %c0_49, %c0_50] : memref<25x8x8xbf16, #tpu.memory_space<vmem>>, vector<1x8x8xbf16>
    %96 = vector.shape_cast %95 : vector<1x8x8xbf16> to vector<8x8xbf16>
    %cst_51 = arith.constant dense<0.000000e+00> : vector<8x384xf32>
    %97 = tpu.matmul %96, %94, %cst_51 {dimension_numbers = #tpu.dot_dimension_numbers<[1], [0], [0], [1], [0, 0, 1, 1], [], []>} : vector<8x8xbf16>, vector<8x384xbf16>, vector<8x384xf32> -> vector<8x384xf32>
    %98 = arith.addf %92, %97 : vector<8x384xf32>
    %99 = vector.extract_strided_slice %1 {offsets = [0, 60], sizes = [8, 384], strides = [1, 1]} : vector<8x512xf32> to vector<8x384xf32>
    %100 = arith.truncf %99 : vector<8x384xf32> to vector<8x384xbf16>
    %c15 = arith.constant 15 : index
    %c0_52 = arith.constant 0 : index
    %c0_53 = arith.constant 0 : index
    %101 = vector.load %arg1[%c15, %c0_52, %c0_53] : memref<25x8x8xbf16, #tpu.memory_space<vmem>>, vector<1x8x8xbf16>
    %102 = vector.shape_cast %101 : vector<1x8x8xbf16> to vector<8x8xbf16>
    %cst_54 = arith.constant dense<0.000000e+00> : vector<8x384xf32>
    %103 = tpu.matmul %102, %100, %cst_54 {dimension_numbers = #tpu.dot_dimension_numbers<[1], [0], [0], [1], [0, 0, 1, 1], [], []>} : vector<8x8xbf16>, vector<8x384xbf16>, vector<8x384xf32> -> vector<8x384xf32>
    %104 = arith.addf %98, %103 : vector<8x384xf32>
    %105 = vector.extract_strided_slice %1 {offsets = [0, 61], sizes = [8, 384], strides = [1, 1]} : vector<8x512xf32> to vector<8x384xf32>
    %106 = arith.truncf %105 : vector<8x384xf32> to vector<8x384xbf16>
    %c16 = arith.constant 16 : index
    %c0_55 = arith.constant 0 : index
    %c0_56 = arith.constant 0 : index
    %107 = vector.load %arg1[%c16, %c0_55, %c0_56] : memref<25x8x8xbf16, #tpu.memory_space<vmem>>, vector<1x8x8xbf16>
    %108 = vector.shape_cast %107 : vector<1x8x8xbf16> to vector<8x8xbf16>
    %cst_57 = arith.constant dense<0.000000e+00> : vector<8x384xf32>
    %109 = tpu.matmul %108, %106, %cst_57 {dimension_numbers = #tpu.dot_dimension_numbers<[1], [0], [0], [1], [0, 0, 1, 1], [], []>} : vector<8x8xbf16>, vector<8x384xbf16>, vector<8x384xf32> -> vector<8x384xf32>
    %110 = arith.addf %104, %109 : vector<8x384xf32>
    %111 = vector.extract_strided_slice %1 {offsets = [0, 62], sizes = [8, 384], strides = [1, 1]} : vector<8x512xf32> to vector<8x384xf32>
    %112 = arith.truncf %111 : vector<8x384xf32> to vector<8x384xbf16>
    %c17 = arith.constant 17 : index
    %c0_58 = arith.constant 0 : index
    %c0_59 = arith.constant 0 : index
    %113 = vector.load %arg1[%c17, %c0_58, %c0_59] : memref<25x8x8xbf16, #tpu.memory_space<vmem>>, vector<1x8x8xbf16>
    %114 = vector.shape_cast %113 : vector<1x8x8xbf16> to vector<8x8xbf16>
    %cst_60 = arith.constant dense<0.000000e+00> : vector<8x384xf32>
    %115 = tpu.matmul %114, %112, %cst_60 {dimension_numbers = #tpu.dot_dimension_numbers<[1], [0], [0], [1], [0, 0, 1, 1], [], []>} : vector<8x8xbf16>, vector<8x384xbf16>, vector<8x384xf32> -> vector<8x384xf32>
    %116 = arith.addf %110, %115 : vector<8x384xf32>
    %117 = vector.extract_strided_slice %1 {offsets = [0, 63], sizes = [8, 384], strides = [1, 1]} : vector<8x512xf32> to vector<8x384xf32>
    %118 = arith.truncf %117 : vector<8x384xf32> to vector<8x384xbf16>
    %c18 = arith.constant 18 : index
    %c0_61 = arith.constant 0 : index
    %c0_62 = arith.constant 0 : index
    %119 = vector.load %arg1[%c18, %c0_61, %c0_62] : memref<25x8x8xbf16, #tpu.memory_space<vmem>>, vector<1x8x8xbf16>
    %120 = vector.shape_cast %119 : vector<1x8x8xbf16> to vector<8x8xbf16>
    %cst_63 = arith.constant dense<0.000000e+00> : vector<8x384xf32>
    %121 = tpu.matmul %120, %118, %cst_63 {dimension_numbers = #tpu.dot_dimension_numbers<[1], [0], [0], [1], [0, 0, 1, 1], [], []>} : vector<8x8xbf16>, vector<8x384xbf16>, vector<8x384xf32> -> vector<8x384xf32>
    %122 = arith.addf %116, %121 : vector<8x384xf32>
    %123 = vector.extract_strided_slice %1 {offsets = [0, 64], sizes = [8, 384], strides = [1, 1]} : vector<8x512xf32> to vector<8x384xf32>
    %124 = arith.truncf %123 : vector<8x384xf32> to vector<8x384xbf16>
    %c19 = arith.constant 19 : index
    %c0_64 = arith.constant 0 : index
    %c0_65 = arith.constant 0 : index
    %125 = vector.load %arg1[%c19, %c0_64, %c0_65] : memref<25x8x8xbf16, #tpu.memory_space<vmem>>, vector<1x8x8xbf16>
    %126 = vector.shape_cast %125 : vector<1x8x8xbf16> to vector<8x8xbf16>
    %cst_66 = arith.constant dense<0.000000e+00> : vector<8x384xf32>
    %127 = tpu.matmul %126, %124, %cst_66 {dimension_numbers = #tpu.dot_dimension_numbers<[1], [0], [0], [1], [0, 0, 1, 1], [], []>} : vector<8x8xbf16>, vector<8x384xbf16>, vector<8x384xf32> -> vector<8x384xf32>
    %128 = arith.addf %122, %127 : vector<8x384xf32>
    %129 = vector.extract_strided_slice %1 {offsets = [0, 80], sizes = [8, 384], strides = [1, 1]} : vector<8x512xf32> to vector<8x384xf32>
    %130 = arith.truncf %129 : vector<8x384xf32> to vector<8x384xbf16>
    %c20 = arith.constant 20 : index
    %c0_67 = arith.constant 0 : index
    %c0_68 = arith.constant 0 : index
    %131 = vector.load %arg1[%c20, %c0_67, %c0_68] : memref<25x8x8xbf16, #tpu.memory_space<vmem>>, vector<1x8x8xbf16>
    %132 = vector.shape_cast %131 : vector<1x8x8xbf16> to vector<8x8xbf16>
    %cst_69 = arith.constant dense<0.000000e+00> : vector<8x384xf32>
    %133 = tpu.matmul %132, %130, %cst_69 {dimension_numbers = #tpu.dot_dimension_numbers<[1], [0], [0], [1], [0, 0, 1, 1], [], []>} : vector<8x8xbf16>, vector<8x384xbf16>, vector<8x384xf32> -> vector<8x384xf32>
    %134 = arith.addf %128, %133 : vector<8x384xf32>
    %135 = vector.extract_strided_slice %1 {offsets = [0, 81], sizes = [8, 384], strides = [1, 1]} : vector<8x512xf32> to vector<8x384xf32>
    %136 = arith.truncf %135 : vector<8x384xf32> to vector<8x384xbf16>
    %c21 = arith.constant 21 : index
    %c0_70 = arith.constant 0 : index
    %c0_71 = arith.constant 0 : index
    %137 = vector.load %arg1[%c21, %c0_70, %c0_71] : memref<25x8x8xbf16, #tpu.memory_space<vmem>>, vector<1x8x8xbf16>
    %138 = vector.shape_cast %137 : vector<1x8x8xbf16> to vector<8x8xbf16>
    %cst_72 = arith.constant dense<0.000000e+00> : vector<8x384xf32>
    %139 = tpu.matmul %138, %136, %cst_72 {dimension_numbers = #tpu.dot_dimension_numbers<[1], [0], [0], [1], [0, 0, 1, 1], [], []>} : vector<8x8xbf16>, vector<8x384xbf16>, vector<8x384xf32> -> vector<8x384xf32>
    %140 = arith.addf %134, %139 : vector<8x384xf32>
    %141 = vector.extract_strided_slice %1 {offsets = [0, 82], sizes = [8, 384], strides = [1, 1]} : vector<8x512xf32> to vector<8x384xf32>
    %142 = arith.truncf %141 : vector<8x384xf32> to vector<8x384xbf16>
    %c22 = arith.constant 22 : index
    %c0_73 = arith.constant 0 : index
    %c0_74 = arith.constant 0 : index
    %143 = vector.load %arg1[%c22, %c0_73, %c0_74] : memref<25x8x8xbf16, #tpu.memory_space<vmem>>, vector<1x8x8xbf16>
    %144 = vector.shape_cast %143 : vector<1x8x8xbf16> to vector<8x8xbf16>
    %cst_75 = arith.constant dense<0.000000e+00> : vector<8x384xf32>
    %145 = tpu.matmul %144, %142, %cst_75 {dimension_numbers = #tpu.dot_dimension_numbers<[1], [0], [0], [1], [0, 0, 1, 1], [], []>} : vector<8x8xbf16>, vector<8x384xbf16>, vector<8x384xf32> -> vector<8x384xf32>
    %146 = arith.addf %140, %145 : vector<8x384xf32>
    %147 = vector.extract_strided_slice %1 {offsets = [0, 83], sizes = [8, 384], strides = [1, 1]} : vector<8x512xf32> to vector<8x384xf32>
    %148 = arith.truncf %147 : vector<8x384xf32> to vector<8x384xbf16>
    %c23 = arith.constant 23 : index
    %c0_76 = arith.constant 0 : index
    %c0_77 = arith.constant 0 : index
    %149 = vector.load %arg1[%c23, %c0_76, %c0_77] : memref<25x8x8xbf16, #tpu.memory_space<vmem>>, vector<1x8x8xbf16>
    %150 = vector.shape_cast %149 : vector<1x8x8xbf16> to vector<8x8xbf16>
    %cst_78 = arith.constant dense<0.000000e+00> : vector<8x384xf32>
    %151 = tpu.matmul %150, %148, %cst_78 {dimension_numbers = #tpu.dot_dimension_numbers<[1], [0], [0], [1], [0, 0, 1, 1], [], []>} : vector<8x8xbf16>, vector<8x384xbf16>, vector<8x384xf32> -> vector<8x384xf32>
    %152 = arith.addf %146, %151 : vector<8x384xf32>
    %153 = vector.extract_strided_slice %1 {offsets = [0, 84], sizes = [8, 384], strides = [1, 1]} : vector<8x512xf32> to vector<8x384xf32>
    %154 = arith.truncf %153 : vector<8x384xf32> to vector<8x384xbf16>
    %c24 = arith.constant 24 : index
    %c0_79 = arith.constant 0 : index
    %c0_80 = arith.constant 0 : index
    %155 = vector.load %arg1[%c24, %c0_79, %c0_80] : memref<25x8x8xbf16, #tpu.memory_space<vmem>>, vector<1x8x8xbf16>
    %156 = vector.shape_cast %155 : vector<1x8x8xbf16> to vector<8x8xbf16>
    %cst_81 = arith.constant dense<0.000000e+00> : vector<8x384xf32>
    %157 = tpu.matmul %156, %154, %cst_81 {dimension_numbers = #tpu.dot_dimension_numbers<[1], [0], [0], [1], [0, 0, 1, 1], [], []>} : vector<8x8xbf16>, vector<8x384xbf16>, vector<8x384xf32> -> vector<8x384xf32>
    %158 = arith.addf %152, %157 : vector<8x384xf32>
    %cst_82 = arith.constant 0.707106769 : f32
    %159 = vector.broadcast %cst_82 : f32 to vector<8x384xf32>
    %160 = arith.mulf %158, %159 : vector<8x384xf32>
    %cst_83 = arith.constant 0.000000e+00 : f32
    %161 = vector.broadcast %cst_83 : f32 to vector<8x384xf32>
    %162 = arith.cmpf oge, %160, %161 : vector<8x384xf32>
    %cst_84 = arith.constant 1.000000e+00 : f32
    %cst_85 = arith.constant -1.000000e+00 : f32
    %163 = vector.broadcast %cst_84 : f32 to vector<8x384xf32>
    %164 = vector.broadcast %cst_85 : f32 to vector<8x384xf32>
    %165 = arith.select %162, %163, %164 : vector<8x384xi1>, vector<8x384xf32>
    %166 = math.absf %160 : vector<8x384xf32>
    %cst_86 = arith.constant 0.327591091 : f32
    %167 = vector.broadcast %cst_86 : f32 to vector<8x384xf32>
    %168 = arith.mulf %167, %166 : vector<8x384xf32>
    %cst_87 = arith.constant 1.000000e+00 : f32
    %169 = vector.broadcast %cst_87 : f32 to vector<8x384xf32>
    %170 = arith.addf %169, %168 : vector<8x384xf32>
    %171 = tpu.reciprocal %170 {approx = true} : vector<8x384xf32> -> vector<8x384xf32>
    %cst_88 = arith.constant 1.06140542 : f32
    %172 = vector.broadcast %cst_88 : f32 to vector<8x384xf32>
    %173 = arith.mulf %171, %172 : vector<8x384xf32>
    %cst_89 = arith.constant -1.45315206 : f32
    %174 = vector.broadcast %cst_89 : f32 to vector<8x384xf32>
    %175 = arith.addf %174, %173 : vector<8x384xf32>
    %176 = arith.mulf %171, %175 : vector<8x384xf32>
    %cst_90 = arith.constant 1.42141378 : f32
    %177 = vector.broadcast %cst_90 : f32 to vector<8x384xf32>
    %178 = arith.addf %177, %176 : vector<8x384xf32>
    %179 = arith.mulf %171, %178 : vector<8x384xf32>
    %cst_91 = arith.constant -0.284496725 : f32
    %180 = vector.broadcast %cst_91 : f32 to vector<8x384xf32>
    %181 = arith.addf %180, %179 : vector<8x384xf32>
    %182 = arith.mulf %171, %181 : vector<8x384xf32>
    %cst_92 = arith.constant 0.254829586 : f32
    %183 = vector.broadcast %cst_92 : f32 to vector<8x384xf32>
    %184 = arith.addf %183, %182 : vector<8x384xf32>
    %185 = arith.mulf %171, %184 : vector<8x384xf32>
    %cst_93 = arith.constant 0.000000e+00 : f32
    %186 = vector.broadcast %cst_93 : f32 to vector<8x384xf32>
    %187 = arith.subf %186, %166 : vector<8x384xf32>
    %188 = arith.mulf %187, %166 : vector<8x384xf32>
    %189 = math.exp %188 : vector<8x384xf32>
    %190 = arith.mulf %185, %189 : vector<8x384xf32>
    %cst_94 = arith.constant 1.000000e+00 : f32
    %191 = vector.broadcast %cst_94 : f32 to vector<8x384xf32>
    %192 = arith.subf %191, %190 : vector<8x384xf32>
    %193 = arith.mulf %165, %192 : vector<8x384xf32>
    %cst_95 = arith.constant 5.000000e-01 : f32
    %194 = vector.broadcast %cst_95 : f32 to vector<8x384xf32>
    %195 = arith.mulf %194, %158 : vector<8x384xf32>
    %cst_96 = arith.constant 1.000000e+00 : f32
    %196 = vector.broadcast %cst_96 : f32 to vector<8x384xf32>
    %197 = arith.addf %196, %193 : vector<8x384xf32>
    %198 = arith.mulf %195, %197 : vector<8x384xf32>
    %c0_97 = arith.constant 0 : index
    %c0_98 = arith.constant 0 : index
    %c0_99 = arith.constant 0 : index
    %199 = vector.load %arg5[%c0_97, %c0_98, %c0_99] : memref<1x8x384xf32, #tpu.memory_space<vmem>>, vector<1x8x384xf32>
    %200 = vector.shape_cast %199 : vector<1x8x384xf32> to vector<8x384xf32>
    %201 = vector.shape_cast %198 : vector<8x384xf32> to vector<1x8x384xf32>
    tpu.vector_store %arg5[%c0_97, %c0_98, %c0_99], %201 {strides = array<i32>} : memref<1x8x384xf32, #tpu.memory_space<vmem>>, vector<1x8x384xf32>,
    return
  }
  func.func @transform_0(%arg0: i32) -> (i32, i32, i32) {
    %c0_i32 = arith.constant 0 : i32
    %c0_i32_0 = arith.constant 0 : i32
    %c0_i32_1 = arith.constant 0 : i32
    %c0_i32_2 = arith.constant 0 : i32
    return %c0_i32, %c0_i32_0, %c0_i32_1 : i32, i32, i32
  }
  func.func @transform_1(%arg0: i32) -> (i32, i32, i32) {
    %c0_i32 = arith.constant 0 : i32
    %c0_i32_0 = arith.constant 0 : i32
    %c0_i32_1 = arith.constant 0 : i32
    return %arg0, %c0_i32, %c0_i32_0 : i32, i32, i32
  }
  func.func @transform_2(%arg0: i32) -> (i32, i32) {
    %c0_i32 = arith.constant 0 : i32
    %c0_i32_0 = arith.constant 0 : i32
    %c0_i32_1 = arith.constant 0 : i32
    return %c0_i32, %c0_i32_0 : i32, i32
  }
  func.func @transform_3(%arg0: i32) -> (i32, i32, i32) {
    %c0_i32 = arith.constant 0 : i32
    %c0_i32_0 = arith.constant 0 : i32
    %c0_i32_1 = arith.constant 0 : i32
    return %arg0, %c0_i32, %c0_i32_0 : i32, i32, i32
  }
  func.func @transform_4(%arg0: i32) -> (i32, i32, i32) {
    %c0_i32 = arith.constant 0 : i32
    %c0_i32_0 = arith.constant 0 : i32
    %c0_i32_1 = arith.constant 0 : i32
    return %arg0, %c0_i32, %c0_i32_0 : i32, i32, i32
  }
}

</mosaic_0001>

<bundles_post_ra>
// kernel: reverse.0
= control target key start
LH: loop header
LB: loop body
LE: loop exit
PB: predicated region body
PF: predicated region fallthrough
CT: control target
= control target key end

     0   :  { %v72_v3 = vlaneseq  ;;  %v65_v9 = vld [vmem:[#allocation0 + $0x7] ss:$-1 sm:$0xff]  ;;  %v79_v12 = vld [vmem:[#allocation0 + $0x17] ss:$-1 sm:$0xff]  ;;  %s331_s0 = inlined_call_operand.vmem [shape: f32[2,4,16,7], index: 0, kind: input, shape index: {}]   ;;  %s332_s1 = inlined_call_operand.vmem [shape: f32[2,4,16,7], index: 1, kind: output, shape index: {}]  }
   0x1   :  { %v45_v0 = vld [vmem:[%s331_s0] sm:$0xff]  ;;  %v47_v1 = vld [vmem:[%s331_s0 + $0x8] sm:$0xff]  ;;  %v49_v2 = vld [vmem:[%s331_s0 + $0x10] sm:$0xff]  ;;  %v66_v10 = vrot.slane %v65_v9, 1  ;;  %v80_v14 = vrot.slane %v79_v12, 1 }
   0x2   :  { %46 = vst [vmem:[#allocation0 + $0x8] sm:$0xff] %v45_v0  ;;  %48 = vst [vmem:[#allocation0 + $0x18] sm:$0xff] %v47_v1  ;;  %v51_v4 = vld [vmem:[%s331_s0 + $0x18] sm:$0xff]  ;;  %v53_v5 = vld [vmem:[%s331_s0 + $0x20] sm:$0xff]  ;;  %v73_v11 = vshrl.u32 %v72_v3, 7 }
   0x3   :  { %50 = vst [vmem:[#allocation0 + $0x28] sm:$0xff] %v49_v2  ;;  %v55_v6 = vld [vmem:[%s331_s0 + $0x28] sm:$0xff]  ;;  %52 = vst [vmem:[#allocation0 + $0x38] sm:$0xff] %v51_v4  ;;  %v57_v7 = vld [vmem:[%s331_s0 + $0x30] sm:$0xff] }
   0x4   :  { %54 = vst [vmem:[#allocation0 + $0x48] sm:$0xff] %v53_v5  ;;  %56 = vst [vmem:[#allocation0 + $0x58] sm:$0xff] %v55_v6  ;;  %v59_v8 = vld [vmem:[%s331_s0 + $0x38] sm:$0xff]  ;;  %v93_v13 = vld [vmem:[#allocation0 + $0x27] ss:$-1 sm:$0xff]  ;;  %vm74_vm0 = vcmp.lt.s32.totalorder %v73_v11, 7 }
   0x5   :  { %58 = vst [vmem:[#allocation0 + $0x68] sm:$0xff] %v57_v7  ;;  %60 = vst [vmem:[#allocation0 + $0x78] sm:$0xff] %v59_v8  ;;  %v94_v15 = vrot.slane %v93_v13, 1  ;;  %v107_v16 = vld [vmem:[#allocation0 + $0x37] ss:$-1 sm:$0xff] }
   0x6   :  { %67 = vst [vmem:[#allocation1] sm:$0xff] %v66_v10  ;;  %v108_v17 = vrot.slane %v107_v16, 1  ;;  %v121_v18 = vld [vmem:[#allocation0 + $0x47] ss:$-1 sm:$0xff]  ;;  %v135_v19 = vld [vmem:[#allocation0 + $0x57] ss:$-1 sm:$0xff] }
   0x7   :  { %81 = vst [vmem:[#allocation1 + $0x8] sm:$0xff] %v80_v14  ;;  %95 = vst [vmem:[#allocation1 + $0x10] sm:$0xff] %v94_v15  ;;  %v122_v20 = vrot.slane %v121_v18, 1  ;;  %v136_v21 = vrot.slane %v135_v19, 1  ;;  %v149_v22 = vld [vmem:[#allocation0 + $0x67] ss:$-1 sm:$0xff] }
   0x8   :  { %v163_v23 = vld [vmem:[#allocation0 + $0x77] ss:$-1 sm:$0xff]  ;;  %109 = vst [vmem:[#allocation1 + $0x18] sm:$0xff] %v108_v17  ;;  %v150_v24 = vrot.slane %v149_v22, 1 }
   0x9   :  { %v164_v25 = vrot.slane %v163_v23, 1  ;;  %v70_v26 = vld [vmem:[#allocation0 + $0xf] ss:$-1 sm:$0xff]  ;;  %v84_v27 = vld [vmem:[#allocation0 + $0x1f] ss:$-1 sm:$0xff]  ;;  %123 = vst [vmem:[#allocation1 + $0x20] sm:$0xff] %v122_v20 }
   0xa   :  { %v98_v28 = vld [vmem:[#allocation0 + $0x2f] ss:$-1 sm:$0xff]  ;;  %137 = vst [vmem:[#allocation1 + $0x28] sm:$0xff] %v136_v21  ;;  %v71_v29 = vrot.slane %v70_v26, 1  ;;  %v85_v30 = vrot.slane %v84_v27, 1  ;;  %151 = vst [vmem:[#allocation1 + $0x30] sm:$0xff] %v150_v24 }
   0xb   :  { %v99_v31 = vrot.slane %v98_v28, 1  ;;  %v112_v32 = vld [vmem:[#allocation0 + $0x3f] ss:$-1 sm:$0xff]  ;;  %165 = vst [vmem:[#allocation1 + $0x38] sm:$0xff] %v164_v25  ;;  %v126_v34 = vld [vmem:[#allocation0 + $0x4f] ss:$-1 sm:$0xff] }
   0xc   :  { %v113_v33 = vrot.slane %v112_v32, 1  ;;  %v140_v35 = vld [vmem:[#allocation0 + $0x5f] ss:$-1 sm:$0xff]  ;;  %75 = vst.msk [vmem:[#allocation1] sm:$0xff] %vm74_vm0, %v71_v29  ;;  %89 = vst.msk [vmem:[#allocation1 + $0x8] sm:$0xff] %vm74_vm0, %v85_v30  ;;  %v127_v36 = vrot.slane %v126_v34, 1 }
   0xd   :  { %103 = vst.msk [vmem:[#allocation1 + $0x10] sm:$0xff] %vm74_vm0, %v99_v31  ;;  %v141_v37 = vrot.slane %v140_v35, 1  ;;  %v154_v38 = vld [vmem:[#allocation0 + $0x6f] ss:$-1 sm:$0xff]  ;;  %v168_v39 = vld [vmem:[#allocation0 + $0x7f] ss:$-1 sm:$0xff] }
   0xe   :  { %117 = vst.msk [vmem:[#allocation1 + $0x18] sm:$0xff] %vm74_vm0, %v113_v33  ;;  %v155_v40 = vrot.slane %v154_v38, 1  ;;  %v169_v41 = vrot.slane %v168_v39, 1  ;;  %131 = vst.msk [vmem:[#allocation1 + $0x20] sm:$0xff] %vm74_vm0, %v127_v36 }
   0xf   :  { %145 = vst.msk [vmem:[#allocation1 + $0x28] sm:$0xff] %vm74_vm0, %v141_v37 }
  0x10   :  { %159 = vst.msk [vmem:[#allocation1 + $0x30] sm:$0xff] %vm74_vm0, %v155_v40  ;;  %173 = vst.msk [vmem:[#allocation1 + $0x38] sm:$0xff] %vm74_vm0, %v169_v41 }
  0x13   :  { %v216_v42 = vld [vmem:[#allocation1] sm:$0xff]  ;;  %v218_v43 = vld [vmem:[#allocation1 + $0x8] sm:$0xff] }
  0x14   :  { %v220_v44 = vld [vmem:[#allocation1 + $0x10] sm:$0xff]  ;;  %217 = vst [vmem:[%s332_s1] sm:$0xff] %v216_v42  ;;  %219 = vst [vmem:[%s332_s1 + $0x8] sm:$0xff] %v218_v43 }
  0x15   :  { %221 = vst [vmem:[%s332_s1 + $0x10] sm:$0xff] %v220_v44  ;;  %v222_v45 = vld [vmem:[#allocation1 + $0x18] sm:$0xff]  ;;  %v224_v46 = vld [vmem:[#allocation1 + $0x20] sm:$0xff] }
  0x16   :  { %223 = vst [vmem:[%s332_s1 + $0x18] sm:$0xff] %v222_v45  ;;  %v226_v47 = vld [vmem:[#allocation1 + $0x28] sm:$0xff]  ;;  %225 = vst [vmem:[%s332_s1 + $0x20] sm:$0xff] %v224_v46 }
  0x17   :  { %227 = vst [vmem:[%s332_s1 + $0x28] sm:$0xff] %v226_v47  ;;  %v228_v48 = vld [vmem:[#allocation1 + $0x30] sm:$0xff]  ;;  %v230_v49 = vld [vmem:[#allocation1 + $0x38] sm:$0xff] }
  0x18   :  { %229 = vst [vmem:[%s332_s1 + $0x30] sm:$0xff] %v228_v48  ;;  %231 = vst [vmem:[%s332_s1 + $0x38] sm:$0xff] %v230_v49 }

// kernel: dlk_conv_act.2
= control target key start
LH: loop header
LB: loop body
LE: loop exit
PB: predicated region body
PF: predicated region fallthrough
CT: control target
= control target key end

     0   :  { %s429_s9 = smov 0   ;;  %s431_s10 = smov 0   ;;  %s462_s0 = inlined_call_operand.vmem [shape: f32[8,8], index: 0, kind: input, shape index: {}]   ;;  %s463_s1 = inlined_call_operand.vmem [shape: f32[2,8,256], index: 1, kind: input, shape index: {}]   ;;  %s464_s2 = inlined_call_operand.vmem [shape: f32[2,8,256], index: 2, kind: output, shape index: {}]  }
   0x1   :  { %s433_s11 = smov 0  }
   0x2 LB: > { %s24_s12 = sadd.s32 1, %s407_s10  ;;  %p354_p0 = scmp.ge.s32.totalorder %s411_s11, 1  ;;  %s411_s11 = sphi %s433_s11, %s12_s11   ;;  %s407_s10 = sphi %s431_s10, %s466_s10   ;;  %s403_s9 = sphi %s429_s9, %s465_s9  }
   0x3   : > { %p26_p1 = scmp.ge.s32.totalorder %s24_s12, 2  ;;  %p133_p2 = scmp.lt.s32.totalorder %s411_s11, 3 }
   0x5   : > { %s468_s12 = smov (%p26_p1, %s24_s12), 0  ;;  %p134_p3 = pnand %p354_p0, %p133_p2 }
   0x6   : > { %p164_p4 = scmp.lt.s32.totalorder (!%p134_p3), %s403_s9, 1 }
   0x7   : > { %137 = sbr.rel (%p134_p3) target bundleno = 214 (0xd6), region = 28 }
   0xc   : > { %v413_v0 = vmov 0.0   ;;  %s470_s9 = smov (!%p164_p4, %s403_s9), 1  ;;  %v183_v3 = vld [vmem:[%s462_s0] sm:$0xff]  ;;  %vm186_vm0 = vcmask 64512  }
   0xd   : > { %254 = vmatprep.mubr.f32.mxu0 %v413_v0  ;;  %s362_s13 = sshll.u32 %s470_s9, 4 }
   0xe   : > { %s171_s16 = scalar_lea.vmem %s463_s1, %s362_s13  ;;  %s181_s21 = scalar_lea.vmem %s464_s2, %s362_s13 }
   0xf   : > { %v185_v1 = vld [vmem:[%s171_s16 + $0x8] sm:$0xff]  ;;  %v184_v2 = vld [vmem:[%s171_s16] sm:$0xff] }
  0x10   : > { %220 = vmatprep.subr.mxu0 %v185_v1 }
  0x11   : > { %221 = vmatpush1.msra.mxu0 %v184_v2 }
  0x12   : > { %359 = vmatmul.mubr.msk.f32.vlgmr.msra.gmra.mxu0 %vm186_vm0, %v183_v3 }
  0xd2   : > { %v256_v4 = vpop.f32.mrf.mxu0 }
  0xd3   : > { %261 = vst [vmem:[%s181_s21] sm:$0xff] %v256_v4 }
  0xd4   : > { %v258_v5 = vpop.f32.mrf.mxu0 }
  0xd5   : > { %262 = vst [vmem:[%s181_s21 + $0x8] sm:$0xff] %v258_v5 }
  0xd6 PF: > { %s12_s11 = sadd.s32 1, %s411_s11   ;;  %s465_s9 = smov %s407_s10 }
  0xd7   : > { %p9_p5 = scmp.ge.s32.totalorder %s12_s11, 4   ;;  %s466_s10 = smov %s468_s12 }
  0xd9   :  { %11 = sbr.rel (!%p9_p5) target bundleno = 2 (0x2), region = 58 }

// kernel: dlk_conv_act.3
= control target key start
LH: loop header
LB: loop body
LE: loop exit
PB: predicated region body
PF: predicated region fallthrough
CT: control target
= control target key end

     0   :  { %s3574_s15 = smov 0   ;;  %s4092_s0 = inlined_call_operand.vmem [shape: bf16[25,8,8], index: 0, kind: input, shape index: {}]   ;;  %s4093_s1 = inlined_call_operand.vmem [shape: f32[2,8,512], index: 1, kind: input, shape index: {}]   ;;  %s4094_s2 = inlined_call_operand.vmem [shape: f32[8,1], index: 2, kind: input, shape index: {}]   ;;  %s4095_s3 = inlined_call_operand.vmem [shape: f32[2,8,384], index: 3, kind: input, shape index: {}]   ;;  %s4096_s4 = inlined_call_operand.vmem [shape: f32[2,8,384], index: 4, kind: output, shape index: {}]  }
   0x1 LB: > { %s3152_s16 = sadd.s32 4294967295, %s3519_s15   ;;  %p3156_p0 = scmp.ge.s32.totalorder %s3519_s15, 1  ;;  %s3519_s15 = sphi %s3574_s15, %s14_s15  }
   0x2   : > { %p172_p1 = scmp.lt.s32.totalorder %s3519_s15, 3 }
   0x4   : > { %p173_p2 = pnand %p3156_p0, %p172_p1 }
   0x5   : > { %p203_p3 = scmp.lt.s32.totalorder (!%p173_p2), %s3152_s16, 1  ;;  %s3524_s21 = smov (!%p173_p2), 127  }
   0x6   : > { %176 = sbr.rel (%p173_p2) target bundleno = 574 (0x23e), region = 36  ;;  %s3525_s24 = smov (!%p173_p2), 126  }
   0x7   : > { %s3526_s25 = smov (!%p173_p2), 125   ;;  %s3527_s26 = smov (!%p173_p2), 124  }
   0x8   : > { %s3528_s27 = smov (!%p173_p2), 108   ;;  %s3529_s28 = smov (!%p173_p2), 107  }
   0x9   : > { %s3530_s29 = smov (!%p173_p2), 106   ;;  %s3531_s30 = smov (!%p173_p2), 105  }
   0xa   : > { %s3532_s5 = smov (!%p173_p2), 104   ;;  %s3533_s6 = smov (!%p173_p2), 88  }
   0xb   : > { %v3521_v0 = vmov 0.0   ;;  %v3522_v1 = vmov 0   ;;  %s4098_s16 = smov (!%p203_p3, %s3152_s16), 1  ;;  %vm3523_vm0 = vmmov 0   ;;  %vm265_vm1 = vcmask 1043456   ;;  %s3534_s7 = smov 87  }
   0xc   : > { %3313 = vmatprep.subr.bf16.mxu1 %v3521_v0  ;;  %307 = vmatprep.mubr.bf16.mxu0 %v3522_v1  ;;  %s3262_s17 = sshll.u32 %s4098_s16, 5  ;;  %v260_v12 = vld [vmem:[%s4092_s0] sm:$0xf]  ;;  %vm261_vm2 = vcmask 64512   ;;  %s3535_s8 = smov 86   ;;  %vm374_vm3 = vcmask 1039360  }
   0xd   : > { %3315 = vmatprep.mubr.msk.bf16.mxu1 %vm3523_vm0, %v3521_v0  ;;  %3500 = vset.pattern.permute.xlu0 %v3522_v1  ;;  %s207_s20 = scalar_lea.vmem %s4093_s1, %s3262_s17  ;;  %s3536_s9 = smov 85   ;;  %v3164_v22 = vld [vmem:[%s4092_s0 + $0x4] sm:$0xf]  ;;  %vm484_vm4 = vcmask 1031168   ;;  %vm594_vm5 = vcmask 1022976   ;;  %vm704_vm6 = vcmask 1014784  }
   0xe   : > { %v3593_v2 = vld [vmem:[%s207_s20 + $0x10] sm:$0xff]  ;;  %v3595_v3 = vld [vmem:[%s207_s20] sm:$0xff]  ;;  %v3597_v4 = vld [vmem:[%s207_s20 + $0x18] sm:$0xff]  ;;  %s3537_s10 = smov 84   ;;  %s3538_s11 = smov 68   ;;  %vm814_vm7 = vcmask 883712  }
   0xf   : > { %v3601_v5 = vpack.c.bf16 %v3593_v2, %v3593_v2  ;;  %v3605_v6 = vpack.c.bf16 %v3595_v3, %v3595_v3  ;;  %v3607_v7 = vld [vmem:[%s207_s20 + $0x8] sm:$0xff]  ;;  %v3617_v9 = vpack.c.bf16 %v3597_v4, %v3597_v4  ;;  %s3539_s12 = smov 67   ;;  %s3540_s17 = smov 66   ;;  %v3176_v54 = vld [vmem:[%s4092_s0 + $0x10] sm:$0xf]  ;;  %vm924_vm8 = vcmask 875520  }
  0x10   : > { %v3611_v8 = vpack.c.bf16 %v3607_v7, %v3607_v7  ;;  %v3168_v34 = vld [vmem:[%s4092_s0 + $0x8] sm:$0xf]  ;;  %s3541_s20 = smov 65   ;;  %v3172_v44 = vld [vmem:[%s4092_s0 + $0xc] sm:$0xf]  ;;  %s3542_s23 = smov 64  }
  0x11   : > { %370 = vrot.lane.b32.xlu1 %v3601_v5, %s3524_s21  ;;  %366 = vrot.lane.b32.xlu0 %v3605_v6, %s3524_s21  ;;  %v267_v10 = vsel %vm265_vm1, %v3605_v6, 0  ;;  %v273_v11 = vsel %vm265_vm1, %v3601_v5, 0  ;;  %vm1034_vm9 = vcmask 867328   ;;  %vm1144_vm10 = vcmask 859136   ;;  %s3547_s13 = smov 44  }
  0x12   : > { %3161 = vmatprep.subr.msk.bf16.mxu0 %vm265_vm1, %v3611_v8  ;;  %3314 = vmatpush3.bf16.msra.mxu1 %v273_v11  ;;  %vm1254_vm11 = vcmask 850944   ;;  %vm1364_vm12 = vcmask 719872   ;;  %vm1474_vm13 = vcmask 711680   ;;  %vm247_vm14 = vcmask 703488  }
  0x13   : > { %290 = vmatpush1.bf16.msra.mxu0 %v267_v10  ;;  %3319 = vmatprep.subr.bf16.mxu1 %v3521_v0  ;;  %v3180_v10 = vld [vmem:[%s4092_s0 + $0x14] sm:$0xf]  ;;  %vm1694_vm15 = vcmask 695296  }
  0x15   : > { %372 = vrot.lane.b32.xlu1 %v3617_v9, %s3524_s21  ;;  %368 = vrot.lane.b32.xlu0 %v3611_v8, %s3524_s21 }
  0x16   : > { %3162 = vmatmul.mubr.msk.bf16.vlgmr.msra.gmra.mxu0 %vm261_vm2, %v260_v12  ;;  %3316 = vmatmul.mubr.msk.bf16.vlgmr.msra.gmra.mxu1 %vm261_vm2, %v260_v12 }
  0x17   : > { %422 = vmatprep.mubr.bf16.mxu0 %v3522_v1  ;;  %3321 = vmatprep.mubr.msk.bf16.mxu1 %vm3523_vm0, %v3521_v0 }
  0x19   : > { %478 = vrot.lane.b32.xlu1 %v3611_v8, %s3525_s24  ;;  %476 = vrot.lane.b32.xlu0 %v3605_v6, %s3525_s24 }
  0x1d   : > { %482 = vrot.lane.b32.xlu1 %v3617_v9, %s3525_s24  ;;  %480 = vrot.lane.b32.xlu0 %v3601_v5, %s3525_s24 }
  0x21   : > { %588 = vrot.lane.b32.xlu1 %v3611_v8, %s3526_s25  ;;  %586 = vrot.lane.b32.xlu0 %v3605_v6, %s3526_s25 }
  0x25   : > { %592 = vrot.lane.b32.xlu1 %v3617_v9, %s3526_s25  ;;  %590 = vrot.lane.b32.xlu0 %v3601_v5, %s3526_s25  ;;  %s3463_s25 = smul.u32 24, %s4098_s16 }
  0x29   : > { %698 = vrot.lane.b32.xlu1 %v3611_v8, %s3527_s26  ;;  %696 = vrot.lane.b32.xlu0 %v3605_v6, %s3527_s26 }
  0x2d   : > { %702 = vrot.lane.b32.xlu1 %v3617_v9, %s3527_s26  ;;  %700 = vrot.lane.b32.xlu0 %v3601_v5, %s3527_s26  ;;  %s3543_s26 = smov 48  }
  0x31   : > { %808 = vrot.lane.b32.xlu1 %v3611_v8, %s3528_s27  ;;  %806 = vrot.lane.b32.xlu0 %v3605_v6, %s3528_s27 }
  0x35   : > { %812 = vrot.lane.b32.xlu1 %v3617_v9, %s3528_s27  ;;  %810 = vrot.lane.b32.xlu0 %v3601_v5, %s3528_s27 }
  0x39   : > { %918 = vrot.lane.b32.xlu1 %v3611_v8, %s3529_s28  ;;  %916 = vrot.lane.b32.xlu0 %v3605_v6, %s3529_s28 }
  0x3d   : > { %922 = vrot.lane.b32.xlu1 %v3617_v9, %s3529_s28  ;;  %920 = vrot.lane.b32.xlu0 %v3601_v5, %s3529_s28  ;;  %s212_s28 = scalar_lea.vmem %s4095_s3, %s3463_s25 }
  0x41   : > { %1028 = vrot.lane.b32.xlu1 %v3611_v8, %s3530_s29  ;;  %1026 = vrot.lane.b32.xlu0 %v3605_v6, %s3530_s29 }
  0x45   : > { %1032 = vrot.lane.b32.xlu1 %v3617_v9, %s3530_s29  ;;  %1030 = vrot.lane.b32.xlu0 %v3601_v5, %s3530_s29  ;;  %s3544_s29 = smov 47  }
  0x49   : > { %1138 = vrot.lane.b32.xlu1 %v3611_v8, %s3531_s30  ;;  %1136 = vrot.lane.b32.xlu0 %v3605_v6, %s3531_s30 }
  0x4d   : > { %1142 = vrot.lane.b32.xlu1 %v3617_v9, %s3531_s30  ;;  %1140 = vrot.lane.b32.xlu0 %v3601_v5, %s3531_s30 }
  0x51   : > { %1248 = vrot.lane.b32.xlu1 %v3611_v8, %s3532_s5  ;;  %1246 = vrot.lane.b32.xlu0 %v3605_v6, %s3532_s5 }
  0x55   : > { %1252 = vrot.lane.b32.xlu1 %v3617_v9, %s3532_s5  ;;  %1250 = vrot.lane.b32.xlu0 %v3601_v5, %s3532_s5  ;;  %s217_s5 = scalar_lea.vmem %s4096_s4, %s3463_s25 }
  0x59   : > { %1358 = vrot.lane.b32.xlu1 %v3611_v8, %s3533_s6  ;;  %1356 = vrot.lane.b32.xlu0 %v3605_v6, %s3533_s6 }
  0x5d   : > { %1362 = vrot.lane.b32.xlu1 %v3617_v9, %s3533_s6  ;;  %1360 = vrot.lane.b32.xlu0 %v3601_v5, %s3533_s6  ;;  %s3545_s6 = smov 46  }
  0x61   : > { %1468 = vrot.lane.b32.xlu1 %v3611_v8, %s3534_s7  ;;  %1466 = vrot.lane.b32.xlu0 %v3605_v6, %s3534_s7 }
  0x65   : > { %1472 = vrot.lane.b32.xlu1 %v3617_v9, %s3534_s7  ;;  %1470 = vrot.lane.b32.xlu0 %v3601_v5, %s3534_s7 }
  0x69   : > { %1578 = vrot.lane.b32.xlu1 %v3611_v8, %s3535_s8  ;;  %1576 = vrot.lane.b32.xlu0 %v3605_v6, %s3535_s8 }
  0x6d   : > { %1582 = vrot.lane.b32.xlu1 %v3617_v9, %s3535_s8  ;;  %1580 = vrot.lane.b32.xlu0 %v3601_v5, %s3535_s8 }
  0x71   : > { %1688 = vrot.lane.b32.xlu1 %v3611_v8, %s3536_s9  ;;  %1686 = vrot.lane.b32.xlu0 %v3605_v6, %s3536_s9 }
  0x75   : > { %1692 = vrot.lane.b32.xlu1 %v3617_v9, %s3536_s9  ;;  %1690 = vrot.lane.b32.xlu0 %v3601_v5, %s3536_s9 }
  0x79   : > { %1798 = vrot.lane.b32.xlu1 %v3611_v8, %s3537_s10  ;;  %1796 = vrot.lane.b32.xlu0 %v3605_v6, %s3537_s10 }
  0x7d   : > { %1802 = vrot.lane.b32.xlu1 %v3617_v9, %s3537_s10  ;;  %1800 = vrot.lane.b32.xlu0 %v3601_v5, %s3537_s10  ;;  %s3546_s10 = smov 45  }
  0x81   : > { %1908 = vrot.lane.b32.xlu1 %v3611_v8, %s3538_s11  ;;  %1906 = vrot.lane.b32.xlu0 %v3605_v6, %s3538_s11 }
  0x83   : > { %v371_v13 = vpop.permute.xlu1 %370  ;;  %v367_v14 = vpop.permute.xlu0 %366 }
  0x85   : > { %1912 = vrot.lane.b32.xlu1 %v3617_v9, %s3538_s11  ;;  %1910 = vrot.lane.b32.xlu0 %v3601_v5, %s3538_s11 }
  0x87   : > { %v373_v15 = vpop.permute.xlu1 %372  ;;  %v369_v16 = vpop.permute.xlu0 %368 }
  0x88   : > { %v377_v17 = vsel %vm374_vm3, %v371_v13, %v373_v15  ;;  %v375_v18 = vsel %vm374_vm3, %v367_v14, %v369_v16  ;;  %v376_v19 = vsel %vm374_vm3, %v369_v16, %v371_v13  ;;  %vm1804_vm3 = vcmask 687104  }
  0x89   : > { %v388_v20 = vsel %vm265_vm1, %v377_v17, 0  ;;  %v382_v21 = vsel %vm265_vm1, %v375_v18, 0  ;;  %2018 = vrot.lane.b32.xlu1 %v3611_v8, %s3539_s12  ;;  %2016 = vrot.lane.b32.xlu0 %v3605_v6, %s3539_s12 }
  0x8a   : > { %3165 = vmatprep.subr.msk.bf16.mxu0 %vm265_vm1, %v376_v19  ;;  %3320 = vmatpush3.bf16.msra.mxu1 %v388_v20  ;;  %v3184_v20 = vld [vmem:[%s4092_s0 + $0x18] sm:$0xf] }
  0x8b   : > { %405 = vmatpush1.bf16.msra.mxu0 %v382_v21  ;;  %v479_v23 = vpop.permute.xlu1 %478  ;;  %v477_v24 = vpop.permute.xlu0 %476  ;;  %3325 = vmatprep.subr.bf16.mxu1 %v3521_v0 }
  0x8c   : > { %v485_v25 = vsel %vm484_vm4, %v477_v24, %v479_v23 }
  0x8d   : > { %3322 = vmatmul.mubr.msk.bf16.vlgmr.msra.gmra.mxu1 %vm261_vm2, %v3164_v22  ;;  %2022 = vrot.lane.b32.xlu1 %v3617_v9, %s3539_s12  ;;  %v492_v30 = vsel %vm265_vm1, %v485_v25, 0 }
  0x8e   : > { %2020 = vrot.lane.b32.xlu0 %v3601_v5, %s3539_s12  ;;  %3166 = vmatmul.mubr.msk.bf16.vlgmr.msra.gmra.mxu0 %vm261_vm2, %v3164_v22 }
  0x8f   : > { %v483_v26 = vpop.permute.xlu1 %482  ;;  %v481_v27 = vpop.permute.xlu0 %480  ;;  %532 = vmatprep.mubr.bf16.mxu0 %v3522_v1  ;;  %3327 = vmatprep.mubr.msk.bf16.mxu1 %vm3523_vm0, %v3521_v0 }
  0x90   : > { %v486_v28 = vsel %vm484_vm4, %v479_v23, %v481_v27  ;;  %v487_v29 = vsel %vm484_vm4, %v481_v27, %v483_v26  ;;  %vm1914_vm4 = vcmask 556032  }
  0x91   : > { %v498_v31 = vsel %vm265_vm1, %v487_v29, 0  ;;  %2128 = vrot.lane.b32.xlu1 %v3611_v8, %s3540_s17  ;;  %3169 = vmatprep.subr.msk.bf16.mxu0 %vm265_vm1, %v486_v28 }
  0x92   : > { %2126 = vrot.lane.b32.xlu0 %v3605_v6, %s3540_s17  ;;  %515 = vmatpush1.bf16.msra.mxu0 %v492_v30  ;;  %v3188_v30 = vld [vmem:[%s4092_s0 + $0x1c] sm:$0xf] }
  0x93   : > { %3326 = vmatpush3.bf16.msra.mxu1 %v498_v31  ;;  %v589_v32 = vpop.permute.xlu1 %588  ;;  %v587_v33 = vpop.permute.xlu0 %586 }
  0x94   : > { %3331 = vmatprep.subr.bf16.mxu1 %v3521_v0  ;;  %v595_v35 = vsel %vm594_vm5, %v587_v33, %v589_v32 }
  0x95   : > { %2132 = vrot.lane.b32.xlu1 %v3617_v9, %s3540_s17  ;;  %v602_v40 = vsel %vm265_vm1, %v595_v35, 0 }
  0x96   : > { %2130 = vrot.lane.b32.xlu0 %v3601_v5, %s3540_s17  ;;  %3170 = vmatmul.mubr.msk.bf16.vlgmr.msra.gmra.mxu0 %vm261_vm2, %v3168_v34 }
  0x97   : > { %3328 = vmatmul.mubr.msk.bf16.vlgmr.msra.gmra.mxu1 %vm261_vm2, %v3168_v34  ;;  %v593_v36 = vpop.permute.xlu1 %592  ;;  %v591_v37 = vpop.permute.xlu0 %590  ;;  %642 = vmatprep.mubr.bf16.mxu0 %v3522_v1 }
  0x98   : > { %v596_v38 = vsel %vm594_vm5, %v589_v32, %v591_v37  ;;  %v597_v39 = vsel %vm594_vm5, %v591_v37, %v593_v36  ;;  %3333 = vmatprep.mubr.msk.bf16.mxu1 %vm3523_vm0, %v3521_v0  ;;  %vm2024_vm5 = vcmask 547840  }
  0x99   : > { %v608_v41 = vsel %vm265_vm1, %v597_v39, 0  ;;  %2238 = vrot.lane.b32.xlu1 %v3611_v8, %s3541_s20  ;;  %3173 = vmatprep.subr.msk.bf16.mxu0 %vm265_vm1, %v596_v38 }
  0x9a   : > { %2236 = vrot.lane.b32.xlu0 %v3605_v6, %s3541_s20  ;;  %625 = vmatpush1.bf16.msra.mxu0 %v602_v40  ;;  %v3192_v40 = vld [vmem:[%s4092_s0 + $0x20] sm:$0xf] }
  0x9b   : > { %3332 = vmatpush3.bf16.msra.mxu1 %v608_v41  ;;  %v699_v42 = vpop.permute.xlu1 %698  ;;  %v697_v43 = vpop.permute.xlu0 %696 }
  0x9c   : > { %3337 = vmatprep.subr.bf16.mxu1 %v3521_v0  ;;  %v705_v45 = vsel %vm704_vm6, %v697_v43, %v699_v42 }
  0x9d   : > { %2242 = vrot.lane.b32.xlu1 %v3617_v9, %s3541_s20  ;;  %v712_v50 = vsel %vm265_vm1, %v705_v45, 0 }
  0x9e   : > { %2240 = vrot.lane.b32.xlu0 %v3601_v5, %s3541_s20  ;;  %3174 = vmatmul.mubr.msk.bf16.vlgmr.msra.gmra.mxu0 %vm261_vm2, %v3172_v44 }
  0x9f   : > { %3334 = vmatmul.mubr.msk.bf16.vlgmr.msra.gmra.mxu1 %vm261_vm2, %v3172_v44  ;;  %v703_v46 = vpop.permute.xlu1 %702  ;;  %v701_v47 = vpop.permute.xlu0 %700  ;;  %752 = vmatprep.mubr.bf16.mxu0 %v3522_v1 }
  0xa0   : > { %v706_v48 = vsel %vm704_vm6, %v699_v42, %v701_v47  ;;  %v707_v49 = vsel %vm704_vm6, %v701_v47, %v703_v46  ;;  %3339 = vmatprep.mubr.msk.bf16.mxu1 %vm3523_vm0, %v3521_v0  ;;  %vm2134_vm6 = vcmask 539648  }
  0xa1   : > { %v718_v51 = vsel %vm265_vm1, %v707_v49, 0  ;;  %2348 = vrot.lane.b32.xlu1 %v3611_v8, %s3542_s23  ;;  %3177 = vmatprep.subr.msk.bf16.mxu0 %vm265_vm1, %v706_v48 }
  0xa2   : > { %2346 = vrot.lane.b32.xlu0 %v3605_v6, %s3542_s23  ;;  %735 = vmatpush1.bf16.msra.mxu0 %v712_v50  ;;  %v3196_v50 = vld [vmem:[%s4092_s0 + $0x24] sm:$0xf] }
  0xa3   : > { %3338 = vmatpush3.bf16.msra.mxu1 %v718_v51  ;;  %v809_v52 = vpop.permute.xlu1 %808  ;;  %v807_v53 = vpop.permute.xlu0 %806 }
  0xa4   : > { %3343 = vmatprep.subr.bf16.mxu1 %v3521_v0  ;;  %v815_v55 = vsel %vm814_vm7, %v807_v53, %v809_v52 }
  0xa5   : > { %2352 = vrot.lane.b32.xlu1 %v3617_v9, %s3542_s23  ;;  %v822_v60 = vsel %vm265_vm1, %v815_v55, 0 }
  0xa6   : > { %2350 = vrot.lane.b32.xlu0 %v3601_v5, %s3542_s23  ;;  %3178 = vmatmul.mubr.msk.bf16.vlgmr.msra.gmra.mxu0 %vm261_vm2, %v3176_v54 }
  0xa7   : > { %3340 = vmatmul.mubr.msk.bf16.vlgmr.msra.gmra.mxu1 %vm261_vm2, %v3176_v54  ;;  %v813_v56 = vpop.permute.xlu1 %812  ;;  %v811_v57 = vpop.permute.xlu0 %810  ;;  %862 = vmatprep.mubr.bf16.mxu0 %v3522_v1 }
  0xa8   : > { %v816_v58 = vsel %vm814_vm7, %v809_v52, %v811_v57  ;;  %v817_v59 = vsel %vm814_vm7, %v811_v57, %v813_v56  ;;  %3345 = vmatprep.mubr.msk.bf16.mxu1 %vm3523_vm0, %v3521_v0  ;;  %v223_v52 = vld [vmem:[%s4094_s2] sm:$0xff]  ;;  %v3200_v57 = vld [vmem:[%s4092_s0 + $0x28] sm:$0xf]  ;;  %vm2244_vm7 = vcmask 531456  }
  0xa9   : > { %v828_v61 = vsel %vm265_vm1, %v817_v59, 0  ;;  %2458 = vrot.lane.b32.xlu1 %v3611_v8, %s3543_s26  ;;  %3181 = vmatprep.subr.msk.bf16.mxu0 %vm265_vm1, %v816_v58 }
  0xaa   : > { %2456 = vrot.lane.b32.xlu0 %v3605_v6, %s3543_s26  ;;  %845 = vmatpush1.bf16.msra.mxu0 %v822_v60 }
  0xab   : > { %3344 = vmatpush3.bf16.msra.mxu1 %v828_v61  ;;  %v919_v62 = vpop.permute.xlu1 %918  ;;  %v917_v63 = vpop.permute.xlu0 %916 }
  0xac   : > { %3349 = vmatprep.subr.bf16.mxu1 %v3521_v0  ;;  %v925_v11 = vsel %vm924_vm8, %v917_v63, %v919_v62 }
  0xad   : > { %2462 = vrot.lane.b32.xlu1 %v3617_v9, %s3543_s26  ;;  %v932_v16 = vsel %vm265_vm1, %v925_v11, 0 }
  0xae   : > { %2460 = vrot.lane.b32.xlu0 %v3601_v5, %s3543_s26  ;;  %3182 = vmatmul.mubr.msk.bf16.vlgmr.msra.gmra.mxu0 %vm261_vm2, %v3180_v10 }
  0xaf   : > { %3346 = vmatmul.mubr.msk.bf16.vlgmr.msra.gmra.mxu1 %vm261_vm2, %v3180_v10  ;;  %v923_v12 = vpop.permute.xlu1 %922  ;;  %v921_v13 = vpop.permute.xlu0 %920  ;;  %972 = vmatprep.mubr.bf16.mxu0 %v3522_v1 }
  0xb0   : > { %v926_v14 = vsel %vm924_vm8, %v919_v62, %v921_v13  ;;  %v927_v15 = vsel %vm924_vm8, %v921_v13, %v923_v12  ;;  %3351 = vmatprep.mubr.msk.bf16.mxu1 %vm3523_vm0, %v3521_v0  ;;  %vm2354_vm8 = vcmask 523264  }
  0xb1   : > { %v938_v17 = vsel %vm265_vm1, %v927_v15, 0  ;;  %2568 = vrot.lane.b32.xlu1 %v3611_v8, %s3544_s29  ;;  %3185 = vmatprep.subr.msk.bf16.mxu0 %vm265_vm1, %v926_v14 }
  0xb2   : > { %2566 = vrot.lane.b32.xlu0 %v3605_v6, %s3544_s29  ;;  %955 = vmatpush1.bf16.msra.mxu0 %v932_v16  ;;  %v3204_v16 = vld [vmem:[%s4092_s0 + $0x2c] sm:$0xf] }
  0xb3   : > { %3350 = vmatpush3.bf16.msra.mxu1 %v938_v17  ;;  %v1029_v18 = vpop.permute.xlu1 %1028  ;;  %v1027_v19 = vpop.permute.xlu0 %1026 }
  0xb4   : > { %3355 = vmatprep.subr.bf16.mxu1 %v3521_v0  ;;  %v1035_v21 = vsel %vm1034_vm9, %v1027_v19, %v1029_v18 }
  0xb5   : > { %2572 = vrot.lane.b32.xlu1 %v3617_v9, %s3544_s29  ;;  %v1042_v26 = vsel %vm265_vm1, %v1035_v21, 0 }
  0xb6   : > { %2570 = vrot.lane.b32.xlu0 %v3601_v5, %s3544_s29  ;;  %3186 = vmatmul.mubr.msk.bf16.vlgmr.msra.gmra.mxu0 %vm261_vm2, %v3184_v20 }
  0xb7   : > { %3352 = vmatmul.mubr.msk.bf16.vlgmr.msra.gmra.mxu1 %vm261_vm2, %v3184_v20  ;;  %v1033_v22 = vpop.permute.xlu1 %1032  ;;  %v1031_v23 = vpop.permute.xlu0 %1030  ;;  %1082 = vmatprep.mubr.bf16.mxu0 %v3522_v1 }
  0xb8   : > { %v1036_v24 = vsel %vm1034_vm9, %v1029_v18, %v1031_v23  ;;  %v1037_v25 = vsel %vm1034_vm9, %v1031_v23, %v1033_v22  ;;  %3357 = vmatprep.mubr.msk.bf16.mxu1 %vm3523_vm0, %v3521_v0  ;;  %vm2464_vm9 = vcmask 392192  }
  0xb9   : > { %v1048_v27 = vsel %vm265_vm1, %v1037_v25, 0  ;;  %2678 = vrot.lane.b32.xlu1 %v3611_v8, %s3545_s6  ;;  %3189 = vmatprep.subr.msk.bf16.mxu0 %vm265_vm1, %v1036_v24 }
  0xba   : > { %2676 = vrot.lane.b32.xlu0 %v3605_v6, %s3545_s6  ;;  %1065 = vmatpush1.bf16.msra.mxu0 %v1042_v26 }
  0xbb   : > { %3356 = vmatpush3.bf16.msra.mxu1 %v1048_v27  ;;  %v1139_v28 = vpop.permute.xlu1 %1138  ;;  %v1137_v29 = vpop.permute.xlu0 %1136  ;;  %v3208_v27 = vld [vmem:[%s4092_s0 + $0x30] sm:$0xf] }
  0xbc   : > { %3361 = vmatprep.subr.bf16.mxu1 %v3521_v0  ;;  %v1145_v31 = vsel %vm1144_vm10, %v1137_v29, %v1139_v28 }
  0xbd   : > { %2682 = vrot.lane.b32.xlu1 %v3617_v9, %s3545_s6  ;;  %v1152_v36 = vsel %vm265_vm1, %v1145_v31, 0 }
  0xbe   : > { %2680 = vrot.lane.b32.xlu0 %v3601_v5, %s3545_s6  ;;  %3190 = vmatmul.mubr.msk.bf16.vlgmr.msra.gmra.mxu0 %vm261_vm2, %v3188_v30 }
  0xbf   : > { %3358 = vmatmul.mubr.msk.bf16.vlgmr.msra.gmra.mxu1 %vm261_vm2, %v3188_v30  ;;  %v1143_v32 = vpop.permute.xlu1 %1142  ;;  %v1141_v33 = vpop.permute.xlu0 %1140  ;;  %1192 = vmatprep.mubr.bf16.mxu0 %v3522_v1 }
  0xc0   : > { %v1146_v34 = vsel %vm1144_vm10, %v1139_v28, %v1141_v33  ;;  %v1147_v35 = vsel %vm1144_vm10, %v1141_v33, %v1143_v32  ;;  %3363 = vmatprep.mubr.msk.bf16.mxu1 %vm3523_vm0, %v3521_v0  ;;  %vm2574_vm10 = vcmask 384000  }
  0xc1   : > { %v1158_v37 = vsel %vm265_vm1, %v1147_v35, 0  ;;  %2788 = vrot.lane.b32.xlu1 %v3611_v8, %s3546_s10  ;;  %3193 = vmatprep.subr.msk.bf16.mxu0 %vm265_vm1, %v1146_v34 }
  0xc2   : > { %2786 = vrot.lane.b32.xlu0 %v3605_v6, %s3546_s10  ;;  %1175 = vmatpush1.bf16.msra.mxu0 %v1152_v36 }
  0xc3   : > { %3362 = vmatpush3.bf16.msra.mxu1 %v1158_v37  ;;  %v1249_v38 = vpop.permute.xlu1 %1248  ;;  %v1247_v39 = vpop.permute.xlu0 %1246  ;;  %v3212_v37 = vld [vmem:[%s4092_s0 + $0x34] sm:$0xf] }
  0xc4   : > { %3367 = vmatprep.subr.bf16.mxu1 %v3521_v0  ;;  %v1255_v41 = vsel %vm1254_vm11, %v1247_v39, %v1249_v38 }
  0xc5   : > { %2792 = vrot.lane.b32.xlu1 %v3617_v9, %s3546_s10  ;;  %v1262_v46 = vsel %vm265_vm1, %v1255_v41, 0 }
  0xc6   : > { %2790 = vrot.lane.b32.xlu0 %v3601_v5, %s3546_s10  ;;  %3194 = vmatmul.mubr.msk.bf16.vlgmr.msra.gmra.mxu0 %vm261_vm2, %v3192_v40 }
  0xc7   : > { %3364 = vmatmul.mubr.msk.bf16.vlgmr.msra.gmra.mxu1 %vm261_vm2, %v3192_v40  ;;  %v1253_v42 = vpop.permute.xlu1 %1252  ;;  %v1251_v43 = vpop.permute.xlu0 %1250  ;;  %1302 = vmatprep.mubr.bf16.mxu0 %v3522_v1 }
  0xc8   : > { %v1256_v44 = vsel %vm1254_vm11, %v1249_v38, %v1251_v43  ;;  %v1257_v45 = vsel %vm1254_vm11, %v1251_v43, %v1253_v42  ;;  %3369 = vmatprep.mubr.msk.bf16.mxu1 %vm3523_vm0, %v3521_v0  ;;  %vm2684_vm11 = vcmask 375808  }
  0xc9   : > { %v1268_v47 = vsel %vm265_vm1, %v1257_v45, 0  ;;  %2898 = vrot.lane.b32.xlu1 %v3611_v8, %s3547_s13  ;;  %3197 = vmatprep.subr.msk.bf16.mxu0 %vm265_vm1, %v1256_v44 }
  0xca   : > { %2896 = vrot.lane.b32.xlu0 %v3605_v6, %s3547_s13  ;;  %1285 = vmatpush1.bf16.msra.mxu0 %v1262_v46 }
  0xcb   : > { %3368 = vmatpush3.bf16.msra.mxu1 %v1268_v47  ;;  %v1359_v48 = vpop.permute.xlu1 %1358  ;;  %v1357_v49 = vpop.permute.xlu0 %1356  ;;  %v3216_v47 = vld [vmem:[%s4092_s0 + $0x38] sm:$0xf] }
  0xcc   : > { %3373 = vmatprep.subr.bf16.mxu1 %v3521_v0  ;;  %v1365_v51 = vsel %vm1364_vm12, %v1357_v49, %v1359_v48 }
  0xcd   : > { %2902 = vrot.lane.b32.xlu1 %v3617_v9, %s3547_s13  ;;  %v1372_v9 = vsel %vm265_vm1, %v1365_v51, 0 }
  0xce   : > { %2900 = vrot.lane.b32.xlu0 %v3601_v5, %s3547_s13  ;;  %3198 = vmatmul.mubr.msk.bf16.vlgmr.msra.gmra.mxu0 %vm261_vm2, %v3196_v50 }
  0xcf   : > { %3370 = vmatmul.mubr.msk.bf16.vlgmr.msra.gmra.mxu1 %vm261_vm2, %v3196_v50  ;;  %v1363_v6 = vpop.permute.xlu1 %1362  ;;  %v1361_v8 = vpop.permute.xlu0 %1360  ;;  %1412 = vmatprep.mubr.bf16.mxu0 %v3522_v1 }
  0xd0   : > { %v1366_v53 = vsel %vm1364_vm12, %v1359_v48, %v1361_v8  ;;  %v1367_v54 = vsel %vm1364_vm12, %v1361_v8, %v1363_v6  ;;  %3375 = vmatprep.mubr.msk.bf16.mxu1 %vm3523_vm0, %v3521_v0  ;;  %vm2794_vm12 = vcmask 367616  }
  0xd1   : > { %v1378_v5 = vsel %vm265_vm1, %v1367_v54, 0  ;;  %3201 = vmatprep.subr.msk.bf16.mxu0 %vm265_vm1, %v1366_v53  ;;  %239 = vrot.lane.b32.xlu1 %v3595_v3, %s3535_s8 }
  0xd2   : > { %229 = vperm.xlu0 %3500, %v223_v52   ;;  %1395 = vmatpush1.bf16.msra.mxu0 %v1372_v9  ;;  %v3220_v9 = vld [vmem:[%s4092_s0 + $0x3c] sm:$0xf] }
  0xd3   : > { %3374 = vmatpush3.bf16.msra.mxu1 %v1378_v5  ;;  %v1469_v55 = vpop.permute.xlu1 %1468  ;;  %v1467_v56 = vpop.permute.xlu0 %1466 }
  0xd4   : > { %3379 = vmatprep.subr.bf16.mxu1 %v3521_v0  ;;  %v1475_v58 = vsel %vm1474_vm13, %v1467_v56, %v1469_v55 }
  0xd5   : > { %241 = vrot.lane.b32.xlu1 %v3607_v7, %s3535_s8 }
  0xd6   : > { %3202 = vmatmul.mubr.msk.bf16.vlgmr.msra.gmra.mxu0 %vm261_vm2, %v3200_v57  ;;  %243 = vrot.lane.b32.xlu0 %v3593_v2, %s3535_s8  ;;  %v3857_v3 = vpop.f32.mrf.mxu0  ;;  %v3859_v59 = vpop.f32.mrf.mxu1  ;;  %v1482_v2 = vsel %vm265_vm1, %v1475_v58, 0 }
  0xd7   : > { %3376 = vmatmul.mubr.msk.bf16.vlgmr.msra.gmra.mxu1 %vm261_vm2, %v3200_v57  ;;  %v1473_v60 = vpop.permute.xlu1 %1472  ;;  %v1471_v61 = vpop.permute.xlu0 %1470  ;;  %1522 = vmatprep.mubr.bf16.mxu0 %v3522_v1 }
  0xd8   : > { %v1476_v62 = vsel %vm1474_vm13, %v1469_v55, %v1471_v61  ;;  %v1477_v63 = vsel %vm1474_vm13, %v1471_v61, %v1473_v60  ;;  %3381 = vmatprep.mubr.msk.bf16.mxu1 %vm3523_vm0, %v3521_v0  ;;  %v3865_v7 = vpop.f32.mrf.mxu0  ;;  %v3317_v10 = vpop.f32.mrf.mxu1  ;;  %vm2904_vm13 = vcmask 359424  }
  0xd9   : > { %v1488_v11 = vsel %vm265_vm1, %v1477_v63, 0  ;;  %3205 = vmatprep.subr.msk.bf16.mxu0 %vm265_vm1, %v1476_v62  ;;  %245 = vrot.lane.b32.xlu1 %v3597_v4, %s3535_s8  ;;  %v3224_v63 = vld [vmem:[%s4092_s0 + $0x40] sm:$0xf] }
  0xda   : > { %1505 = vmatpush1.bf16.msra.mxu0 %v1482_v2  ;;  %3380 = vmatpush3.bf16.msra.mxu1 %v1488_v11  ;;  %v313_v12 = vpop.f32.mrf.mxu0  ;;  %v353_v13 = vpop.f32.mrf.mxu1 }
  0xdb   : > { %v1579_v14 = vpop.permute.xlu1 %1578  ;;  %v1577_v15 = vpop.permute.xlu0 %1576  ;;  %3385 = vmatprep.subr.bf16.mxu1 %v3521_v0 }
  0xdc   : > { %v314_v17 = vpop.f32.mrf.mxu0  ;;  %v3318_v18 = vpop.f32.mrf.mxu1  ;;  %v1585_v19 = vsel %vm247_vm14, %v1577_v15, %v1579_v14 }
  0xdd   : > { %v1592_v23 = vsel %vm265_vm1, %v1585_v19, 0  ;;  %v3228_v18 = vld [vmem:[%s4092_s0 + $0x44] sm:$0xf] }
  0xde   : > { %3206 = vmatmul.mubr.msk.bf16.vlgmr.msra.gmra.mxu0 %vm261_vm2, %v3204_v16 }
  0xdf   : > { %3382 = vmatmul.mubr.msk.bf16.vlgmr.msra.gmra.mxu1 %vm261_vm2, %v3204_v16  ;;  %v1583_v4 = vpop.permute.xlu1 %1582  ;;  %v1581_v20 = vpop.permute.xlu0 %1580  ;;  %1632 = vmatprep.mubr.bf16.mxu0 %v3522_v1 }
  0xe0   : > { %v1586_v21 = vsel %vm247_vm14, %v1579_v14, %v1581_v20  ;;  %v1587_v22 = vsel %vm247_vm14, %v1581_v20, %v1583_v4  ;;  %3387 = vmatprep.mubr.msk.bf16.mxu1 %vm3523_vm0, %v3521_v0 }
  0xe1   : > { %v1598_v24 = vsel %vm265_vm1, %v1587_v22, 0  ;;  %3209 = vmatprep.subr.msk.bf16.mxu0 %vm265_vm1, %v1586_v21 }
  0xe2   : > { %1615 = vmatpush1.bf16.msra.mxu0 %v1592_v23  ;;  %3386 = vmatpush3.bf16.msra.mxu1 %v1598_v24 }
  0xe3   : > { %v1689_v25 = vpop.permute.xlu1 %1688  ;;  %v1687_v26 = vpop.permute.xlu0 %1686  ;;  %3391 = vmatprep.subr.bf16.mxu1 %v3521_v0 }
  0xe4   : > { %v1695_v28 = vsel %vm1694_vm15, %v1687_v26, %v1689_v25 }
  0xe5   : > { %v1702_v33 = vsel %vm265_vm1, %v1695_v28, 0 }
  0xe6   : > { %3210 = vmatmul.mubr.msk.bf16.vlgmr.msra.gmra.mxu0 %vm261_vm2, %v3208_v27 }
  0xe7   : > { %3388 = vmatmul.mubr.msk.bf16.vlgmr.msra.gmra.mxu1 %vm261_vm2, %v3208_v27  ;;  %v1693_v29 = vpop.permute.xlu1 %1692  ;;  %v1691_v30 = vpop.permute.xlu0 %1690  ;;  %1742 = vmatprep.mubr.bf16.mxu0 %v3522_v1  ;;  %v3232_v27 = vld [vmem:[%s4092_s0 + $0x48] sm:$0xf] }
  0xe8   : > { %v1696_v31 = vsel %vm1694_vm15, %v1689_v25, %v1691_v30  ;;  %v1697_v32 = vsel %vm1694_vm15, %v1691_v30, %v1693_v29  ;;  %3393 = vmatprep.mubr.msk.bf16.mxu1 %vm3523_vm0, %v3521_v0 }
  0xe9   : > { %v1708_v34 = vsel %vm265_vm1, %v1697_v32, 0  ;;  %3213 = vmatprep.subr.msk.bf16.mxu0 %vm265_vm1, %v1696_v31 }
  0xea   : > { %1725 = vmatpush1.bf16.msra.mxu0 %v1702_v33  ;;  %3392 = vmatpush3.bf16.msra.mxu1 %v1708_v34 }
  0xeb   : > { %v1799_v35 = vpop.permute.xlu1 %1798  ;;  %v1797_v36 = vpop.permute.xlu0 %1796  ;;  %3397 = vmatprep.subr.bf16.mxu1 %v3521_v0 }
  0xec   : > { %v1805_v38 = vsel %vm1804_vm3, %v1797_v36, %v1799_v35 }
  0xed   : > { %v1812_v43 = vsel %vm265_vm1, %v1805_v38, 0 }
  0xee   : > { %3214 = vmatmul.mubr.msk.bf16.vlgmr.msra.gmra.mxu0 %vm261_vm2, %v3212_v37 }
  0xef   : > { %3394 = vmatmul.mubr.msk.bf16.vlgmr.msra.gmra.mxu1 %vm261_vm2, %v3212_v37  ;;  %v1803_v39 = vpop.permute.xlu1 %1802  ;;  %v1801_v40 = vpop.permute.xlu0 %1800  ;;  %1852 = vmatprep.mubr.bf16.mxu0 %v3522_v1  ;;  %v3236_v37 = vld [vmem:[%s4092_s0 + $0x4c] sm:$0xf] }
  0xf0   : > { %v1806_v41 = vsel %vm1804_vm3, %v1799_v35, %v1801_v40  ;;  %v1807_v42 = vsel %vm1804_vm3, %v1801_v40, %v1803_v39  ;;  %3399 = vmatprep.mubr.msk.bf16.mxu1 %vm3523_vm0, %v3521_v0 }
  0xf1   : > { %v1818_v44 = vsel %vm265_vm1, %v1807_v42, 0  ;;  %3217 = vmatprep.subr.msk.bf16.mxu0 %vm265_vm1, %v1806_v41 }
  0xf2   : > { %1835 = vmatpush1.bf16.msra.mxu0 %v1812_v43  ;;  %3398 = vmatpush3.bf16.msra.mxu1 %v1818_v44 }
  0xf3   : > { %v1909_v45 = vpop.permute.xlu1 %1908  ;;  %v1907_v46 = vpop.permute.xlu0 %1906  ;;  %3403 = vmatprep.subr.bf16.mxu1 %v3521_v0 }
  0xf4   : > { %v1915_v48 = vsel %vm1914_vm4, %v1907_v46, %v1909_v45 }
  0xf5   : > { %v1922_v8 = vsel %vm265_vm1, %v1915_v48, 0 }
  0xf6   : > { %3218 = vmatmul.mubr.msk.bf16.vlgmr.msra.gmra.mxu0 %vm261_vm2, %v3216_v47 }
  0xf7   : > { %3400 = vmatmul.mubr.msk.bf16.vlgmr.msra.gmra.mxu1 %vm261_vm2, %v3216_v47  ;;  %v1913_v49 = vpop.permute.xlu1 %1912  ;;  %v1911_v50 = vpop.permute.xlu0 %1910  ;;  %1962 = vmatprep.mubr.bf16.mxu0 %v3522_v1  ;;  %v3240_v47 = vld [vmem:[%s4092_s0 + $0x50] sm:$0xf] }
  0xf8   : > { %v1916_v51 = vsel %vm1914_vm4, %v1909_v45, %v1911_v50  ;;  %v1917_v6 = vsel %vm1914_vm4, %v1911_v50, %v1913_v49  ;;  %3405 = vmatprep.mubr.msk.bf16.mxu1 %vm3523_vm0, %v3521_v0 }
  0xf9   : > { %v1928_v52 = vsel %vm265_vm1, %v1917_v6, 0  ;;  %3221 = vmatprep.subr.msk.bf16.mxu0 %vm265_vm1, %v1916_v51 }
  0xfa   : > { %1945 = vmatpush1.bf16.msra.mxu0 %v1922_v8  ;;  %3404 = vmatpush3.bf16.msra.mxu1 %v1928_v52 }
  0xfb   : > { %v2019_v53 = vpop.permute.xlu1 %2018  ;;  %v2017_v54 = vpop.permute.xlu0 %2016  ;;  %3409 = vmatprep.subr.bf16.mxu1 %v3521_v0 }
  0xfc   : > { %v2025_v5 = vsel %vm2024_vm5, %v2017_v54, %v2019_v53 }
  0xfd   : > { %v2032_v60 = vsel %vm265_vm1, %v2025_v5, 0 }
  0xfe   : > { %3222 = vmatmul.mubr.msk.bf16.vlgmr.msra.gmra.mxu0 %vm261_vm2, %v3220_v9 }
  0xff   : > { %3406 = vmatmul.mubr.msk.bf16.vlgmr.msra.gmra.mxu1 %vm261_vm2, %v3220_v9  ;;  %v2023_v55 = vpop.permute.xlu1 %2022  ;;  %2072 = vmatprep.mubr.bf16.mxu0 %v3522_v1  ;;  %v3244_v9 = vld [vmem:[%s4092_s0 + $0x54] sm:$0xf] }
 0x100   : > { %v2021_v56 = vpop.permute.xlu0 %2020  ;;  %3411 = vmatprep.mubr.msk.bf16.mxu1 %vm3523_vm0, %v3521_v0 }
 0x101   : > { %v2026_v57 = vsel %vm2024_vm5, %v2019_v53, %v2021_v56  ;;  %v2027_v58 = vsel %vm2024_vm5, %v2021_v56, %v2023_v55 }
 0x102   : > { %v2038_v61 = vsel %vm265_vm1, %v2027_v58, 0  ;;  %3225 = vmatprep.subr.msk.bf16.mxu0 %vm265_vm1, %v2026_v57 }
 0x103   : > { %2055 = vmatpush1.bf16.msra.mxu0 %v2032_v60  ;;  %3410 = vmatpush3.bf16.msra.mxu1 %v2038_v61  ;;  %v2129_v62 = vpop.permute.xlu1 %2128 }
 0x104   : > { %v2127_v10 = vpop.permute.xlu0 %2126  ;;  %3415 = vmatprep.subr.bf16.mxu1 %v3521_v0 }
 0x105   : > { %v2135_v2 = vsel %vm2134_vm6, %v2127_v10, %v2129_v62  ;;  %v3248_v10 = vld [vmem:[%s4092_s0 + $0x58] sm:$0xf] }
 0x106   : > { %3226 = vmatmul.mubr.msk.bf16.vlgmr.msra.gmra.mxu0 %vm261_vm2, %v3224_v63  ;;  %v2142_v15 = vsel %vm265_vm1, %v2135_v2, 0 }
 0x107   : > { %3412 = vmatmul.mubr.msk.bf16.vlgmr.msra.gmra.mxu1 %vm261_vm2, %v3224_v63  ;;  %v2133_v11 = vpop.permute.xlu1 %2132  ;;  %2182 = vmatprep.mubr.bf16.mxu0 %v3522_v1 }
 0x108   : > { %v2131_v12 = vpop.permute.xlu0 %2130  ;;  %3417 = vmatprep.mubr.msk.bf16.mxu1 %vm3523_vm0, %v3521_v0 }
 0x109   : > { %v2136_v13 = vsel %vm2134_vm6, %v2129_v62, %v2131_v12  ;;  %v2137_v14 = vsel %vm2134_vm6, %v2131_v12, %v2133_v11 }
 0x10a   : > { %v2148_v16 = vsel %vm265_vm1, %v2137_v14, 0  ;;  %3229 = vmatprep.subr.msk.bf16.mxu0 %vm265_vm1, %v2136_v13 }
 0x10b   : > { %2165 = vmatpush1.bf16.msra.mxu0 %v2142_v15  ;;  %3416 = vmatpush3.bf16.msra.mxu1 %v2148_v16  ;;  %v2239_v17 = vpop.permute.xlu1 %2238 }
 0x10c   : > { %v2237_v19 = vpop.permute.xlu0 %2236  ;;  %3421 = vmatprep.subr.bf16.mxu1 %v3521_v0 }
 0x10d   : > { %v2245_v4 = vsel %vm2244_vm7, %v2237_v19, %v2239_v17  ;;  %v3252_v19 = vld [vmem:[%s4092_s0 + $0x5c] sm:$0xf] }
 0x10e   : > { %3230 = vmatmul.mubr.msk.bf16.vlgmr.msra.gmra.mxu0 %vm261_vm2, %v3228_v18  ;;  %v2252_v24 = vsel %vm265_vm1, %v2245_v4, 0 }
 0x10f   : > { %3418 = vmatmul.mubr.msk.bf16.vlgmr.msra.gmra.mxu1 %vm261_vm2, %v3228_v18  ;;  %v2243_v20 = vpop.permute.xlu1 %2242  ;;  %2292 = vmatprep.mubr.bf16.mxu0 %v3522_v1 }
 0x110   : > { %v2241_v21 = vpop.permute.xlu0 %2240  ;;  %3423 = vmatprep.mubr.msk.bf16.mxu1 %vm3523_vm0, %v3521_v0 }
 0x111   : > { %v2246_v22 = vsel %vm2244_vm7, %v2239_v17, %v2241_v21  ;;  %v2247_v23 = vsel %vm2244_vm7, %v2241_v21, %v2243_v20 }
 0x112   : > { %v2258_v25 = vsel %vm265_vm1, %v2247_v23, 0  ;;  %3233 = vmatprep.subr.msk.bf16.mxu0 %vm265_vm1, %v2246_v22 }
 0x113   : > { %2275 = vmatpush1.bf16.msra.mxu0 %v2252_v24  ;;  %3422 = vmatpush3.bf16.msra.mxu1 %v2258_v25  ;;  %v2349_v26 = vpop.permute.xlu1 %2348 }
 0x114   : > { %v2347_v28 = vpop.permute.xlu0 %2346  ;;  %3427 = vmatprep.subr.bf16.mxu1 %v3521_v0 }
 0x115   : > { %v2355_v29 = vsel %vm2354_vm8, %v2347_v28, %v2349_v26 }
 0x116   : > { %3234 = vmatmul.mubr.msk.bf16.vlgmr.msra.gmra.mxu0 %vm261_vm2, %v3232_v27  ;;  %v2362_v34 = vsel %vm265_vm1, %v2355_v29, 0  ;;  %v225_v29 = vld [vmem:[%s212_s28 + $0x8] sm:$0xff] }
 0x117   : > { %3424 = vmatmul.mubr.msk.bf16.vlgmr.msra.gmra.mxu1 %vm261_vm2, %v3232_v27  ;;  %v2353_v30 = vpop.permute.xlu1 %2352  ;;  %2402 = vmatprep.mubr.bf16.mxu0 %v3522_v1  ;;  %v3256_v27 = vld [vmem:[%s4092_s0 + $0x60] sm:$0xf] }
 0x118   : > { %v2351_v31 = vpop.permute.xlu0 %2350  ;;  %3429 = vmatprep.mubr.msk.bf16.mxu1 %vm3523_vm0, %v3521_v0 }
 0x119   : > { %v2356_v32 = vsel %vm2354_vm8, %v2349_v26, %v2351_v31  ;;  %v2357_v33 = vsel %vm2354_vm8, %v2351_v31, %v2353_v30  ;;  %v226_v30 = vld [vmem:[%s212_s28 + $0x10] sm:$0xff] }
 0x11a   : > { %v2368_v35 = vsel %vm265_vm1, %v2357_v33, 0  ;;  %3237 = vmatprep.subr.msk.bf16.mxu0 %vm265_vm1, %v2356_v32 }
 0x11b   : > { %2385 = vmatpush1.bf16.msra.mxu0 %v2362_v34  ;;  %3428 = vmatpush3.bf16.msra.mxu1 %v2368_v35  ;;  %v2459_v36 = vpop.permute.xlu1 %2458 }
 0x11c   : > { %v2457_v38 = vpop.permute.xlu0 %2456  ;;  %3433 = vmatprep.subr.bf16.mxu1 %v3521_v0 }
 0x11d   : > { %v2465_v39 = vsel %vm2464_vm9, %v2457_v38, %v2459_v36 }
 0x11e   : > { %3238 = vmatmul.mubr.msk.bf16.vlgmr.msra.gmra.mxu0 %vm261_vm2, %v3236_v37  ;;  %v2472_v44 = vsel %vm265_vm1, %v2465_v39, 0 }
 0x11f   : > { %3430 = vmatmul.mubr.msk.bf16.vlgmr.msra.gmra.mxu1 %vm261_vm2, %v3236_v37  ;;  %v2463_v40 = vpop.permute.xlu1 %2462  ;;  %2512 = vmatprep.mubr.bf16.mxu0 %v3522_v1 }
 0x120   : > { %v2461_v41 = vpop.permute.xlu0 %2460  ;;  %3435 = vmatprep.mubr.msk.bf16.mxu1 %vm3523_vm0, %v3521_v0 }
 0x121   : > { %v2466_v42 = vsel %vm2464_vm9, %v2459_v36, %v2461_v41  ;;  %v2467_v43 = vsel %vm2464_vm9, %v2461_v41, %v2463_v40 }
 0x122   : > { %v2478_v45 = vsel %vm265_vm1, %v2467_v43, 0  ;;  %3241 = vmatprep.subr.msk.bf16.mxu0 %vm265_vm1, %v2466_v42 }
 0x123   : > { %2495 = vmatpush1.bf16.msra.mxu0 %v2472_v44  ;;  %3434 = vmatpush3.bf16.msra.mxu1 %v2478_v45  ;;  %v2569_v46 = vpop.permute.xlu1 %2568 }
 0x124   : > { %v2567_v48 = vpop.permute.xlu0 %2566  ;;  %3439 = vmatprep.subr.bf16.mxu1 %v3521_v0 }
 0x125   : > { %v2575_v49 = vsel %vm2574_vm10, %v2567_v48, %v2569_v46 }
 0x126   : > { %3242 = vmatmul.mubr.msk.bf16.vlgmr.msra.gmra.mxu0 %vm261_vm2, %v3240_v47  ;;  %v2582_v52 = vsel %vm265_vm1, %v2575_v49, 0 }
 0x127   : > { %3436 = vmatmul.mubr.msk.bf16.vlgmr.msra.gmra.mxu1 %vm261_vm2, %v3240_v47  ;;  %v2573_v50 = vpop.permute.xlu1 %2572  ;;  %2622 = vmatprep.mubr.bf16.mxu0 %v3522_v1 }
 0x128   : > { %v2571_v51 = vpop.permute.xlu0 %2570  ;;  %3441 = vmatprep.mubr.msk.bf16.mxu1 %vm3523_vm0, %v3521_v0 }
 0x129   : > { %v2576_v6 = vsel %vm2574_vm10, %v2569_v46, %v2571_v51  ;;  %v2577_v8 = vsel %vm2574_vm10, %v2571_v51, %v2573_v50 }
 0x12a   : > { %v2588_v53 = vsel %vm265_vm1, %v2577_v8, 0  ;;  %3245 = vmatprep.subr.msk.bf16.mxu0 %vm265_vm1, %v2576_v6 }
 0x12b   : > { %2605 = vmatpush1.bf16.msra.mxu0 %v2582_v52  ;;  %3440 = vmatpush3.bf16.msra.mxu1 %v2588_v53  ;;  %v2679_v54 = vpop.permute.xlu1 %2678 }
 0x12c   : > { %v2677_v5 = vpop.permute.xlu0 %2676  ;;  %3445 = vmatprep.subr.bf16.mxu1 %v3521_v0 }
 0x12d   : > { %v2685_v55 = vsel %vm2684_vm11, %v2677_v5, %v2679_v54 }
 0x12e   : > { %3246 = vmatmul.mubr.msk.bf16.vlgmr.msra.gmra.mxu0 %vm261_vm2, %v3244_v9  ;;  %v2692_v61 = vsel %vm265_vm1, %v2685_v55, 0 }
 0x12f   : > { %3442 = vmatmul.mubr.msk.bf16.vlgmr.msra.gmra.mxu1 %vm261_vm2, %v3244_v9  ;;  %v2683_v56 = vpop.permute.xlu1 %2682  ;;  %2732 = vmatprep.mubr.bf16.mxu0 %v3522_v1 }
 0x130   : > { %v2681_v57 = vpop.permute.xlu0 %2680  ;;  %3447 = vmatprep.mubr.msk.bf16.mxu1 %vm3523_vm0, %v3521_v0 }
 0x131   : > { %v2686_v58 = vsel %vm2684_vm11, %v2679_v54, %v2681_v57  ;;  %v2687_v60 = vsel %vm2684_vm11, %v2681_v57, %v2683_v56 }
 0x132   : > { %v2698_v62 = vsel %vm265_vm1, %v2687_v60, 0  ;;  %3249 = vmatprep.subr.msk.bf16.mxu0 %vm265_vm1, %v2686_v58 }
 0x133   : > { %2715 = vmatpush1.bf16.msra.mxu0 %v2692_v61  ;;  %3446 = vmatpush3.bf16.msra.mxu1 %v2698_v62  ;;  %v2789_v63 = vpop.permute.xlu1 %2788 }
 0x134   : > { %v2787_v2 = vpop.permute.xlu0 %2786  ;;  %3451 = vmatprep.subr.bf16.mxu1 %v3521_v0 }
 0x135   : > { %v2795_v11 = vsel %vm2794_vm12, %v2787_v2, %v2789_v63 }
 0x136   : > { %3250 = vmatmul.mubr.msk.bf16.vlgmr.msra.gmra.mxu0 %vm261_vm2, %v3248_v10  ;;  %v2802_v16 = vsel %vm265_vm1, %v2795_v11, 0 }
 0x137   : > { %3448 = vmatmul.mubr.msk.bf16.vlgmr.msra.gmra.mxu1 %vm261_vm2, %v3248_v10  ;;  %v2793_v12 = vpop.permute.xlu1 %2792  ;;  %2842 = vmatprep.mubr.bf16.mxu0 %v3522_v1 }
 0x138   : > { %v2791_v13 = vpop.permute.xlu0 %2790  ;;  %3453 = vmatprep.mubr.msk.bf16.mxu1 %vm3523_vm0, %v3521_v0 }
 0x139   : > { %v2796_v14 = vsel %vm2794_vm12, %v2789_v63, %v2791_v13  ;;  %v2797_v15 = vsel %vm2794_vm12, %v2791_v13, %v2793_v12 }
 0x13a   : > { %v2808_v17 = vsel %vm265_vm1, %v2797_v15, 0  ;;  %3253 = vmatprep.subr.msk.bf16.mxu0 %vm265_vm1, %v2796_v14 }
 0x13b   : > { %2825 = vmatpush1.bf16.msra.mxu0 %v2802_v16  ;;  %3452 = vmatpush3.bf16.msra.mxu1 %v2808_v17  ;;  %v2899_v18 = vpop.permute.xlu1 %2898 }
 0x13c   : > { %v2897_v4 = vpop.permute.xlu0 %2896  ;;  %3457 = vmatprep.subr.bf16.mxu1 %v3521_v0 }
 0x13d   : > { %v2905_v20 = vsel %vm2904_vm13, %v2897_v4, %v2899_v18 }
 0x13e   : > { %3254 = vmatmul.mubr.msk.bf16.vlgmr.msra.gmra.mxu0 %vm261_vm2, %v3252_v19  ;;  %v2912_v25 = vsel %vm265_vm1, %v2905_v20, 0 }
 0x13f   : > { %3454 = vmatmul.mubr.msk.bf16.vlgmr.msra.gmra.mxu1 %vm261_vm2, %v3252_v19  ;;  %v2903_v21 = vpop.permute.xlu1 %2902  ;;  %2952 = vmatprep.mubr.bf16.mxu0 %v3522_v1  ;;  %v224_v1 = vld [vmem:[%s212_s28] sm:$0xff] }
 0x140   : > { %v2901_v22 = vpop.permute.xlu0 %2900  ;;  %3459 = vmatprep.mubr.msk.bf16.mxu1 %vm3523_vm0, %v3521_v0 }
 0x141   : > { %v2906_v23 = vsel %vm2904_vm13, %v2899_v18, %v2901_v22  ;;  %v2907_v24 = vsel %vm2904_vm13, %v2901_v22, %v2903_v21 }
 0x142   : > { %v2918_v26 = vsel %vm265_vm1, %v2907_v24, 0  ;;  %3257 = vmatprep.subr.msk.bf16.mxu0 %vm265_vm1, %v2906_v23 }
 0x143   : > { %2935 = vmatpush1.bf16.msra.mxu0 %v2912_v25  ;;  %3458 = vmatpush3.bf16.msra.mxu1 %v2918_v26  ;;  %v240_v28 = vpop.permute.xlu1 %239 }
 0x146   : > { %3258 = vmatmul.mubr.msk.bf16.vlgmr.msra.gmra.mxu0 %vm261_vm2, %v3256_v27 }
 0x147   : > { %3460 = vmatmul.mubr.msk.bf16.vlgmr.msra.gmra.mxu1 %vm261_vm2, %v3256_v27  ;;  %v242_v0 = vpop.permute.xlu1 %241 }
 0x148   : > { %v248_v31 = vsel %vm247_vm14, %v240_v28, %v242_v0 }
 0x14b   : > { %v246_v39 = vpop.permute.xlu1 %245 }
 0x14d   : > { %v230_v32 = vpop.permute.xlu0 %229  ;;  %v465_v33 = vpop.f32.mrf.mxu1 }
 0x14e   : > { %v232_v34 = vadd.f32 %v230_v32, %v224_v1  ;;  %v424_v35 = vpop.f32.mrf.mxu0  ;;  %v233_v36 = vadd.f32 %v230_v32, %v225_v29  ;;  %v234_v37 = vadd.f32 %v230_v32, %v226_v30 }
 0x14f   : > { %v3323_v38 = vpop.f32.mrf.mxu1 }
 0x150   : > { %v254_v40 = vadd.f32 %v248_v31, %v232_v34  ;;  %v426_v41 = vpop.f32.mrf.mxu0 }
 0x151   : > { %v244_v42 = vpop.permute.xlu0 %243  ;;  %v468_v43 = vpop.f32.mrf.mxu1 }
 0x152   : > { %v356_v44 = vadd.f32 %v3857_v3, %v254_v40  ;;  %v249_v45 = vsel %vm247_vm14, %v242_v0, %v244_v42  ;;  %v250_v46 = vsel %vm247_vm14, %v244_v42, %v246_v39  ;;  %v428_v47 = vpop.f32.mrf.mxu0 }
 0x153   : > { %v255_v48 = vadd.f32 %v249_v45, %v233_v36  ;;  %v256_v49 = vadd.f32 %v250_v46, %v234_v37  ;;  %v3324_v50 = vpop.f32.mrf.mxu1 }
 0x154   : > { %v471_v51 = vadd.f32 %v424_v35, %v356_v44  ;;  %v429_v6 = vpop.f32.mrf.mxu0 }
 0x155   : > { %v358_v8 = vadd.f32 %v3859_v59, %v256_v49  ;;  %v357_v52 = vadd.f32 %v3865_v7, %v255_v48 }
 0x156   : > { %v534_v53 = vpop.f32.mrf.mxu0 }
 0x157   : > { %v581_v54 = vadd.f32 %v534_v53, %v471_v51  ;;  %v473_v9 = vadd.f32 %v465_v33, %v358_v8  ;;  %v575_v5 = vpop.f32.mrf.mxu1  ;;  %v472_v55 = vadd.f32 %v426_v41, %v357_v52 }
 0x158   : > { %v536_v3 = vpop.f32.mrf.mxu0 }
 0x159   : > { %v583_v56 = vadd.f32 %v575_v5, %v473_v9  ;;  %v582_v57 = vadd.f32 %v536_v3, %v472_v55  ;;  %v3329_v58 = vpop.f32.mrf.mxu1 }
 0x15a   : > { %v538_v60 = vpop.f32.mrf.mxu0 }
 0x15b   : > { %v578_v61 = vpop.f32.mrf.mxu1 }
 0x15c   : > { %v539_v62 = vpop.f32.mrf.mxu0 }
 0x15d   : > { %v3330_v63 = vpop.f32.mrf.mxu1 }
 0x15e   : > { %v644_v10 = vpop.f32.mrf.mxu0 }
 0x15f   : > { %v691_v2 = vadd.f32 %v644_v10, %v581_v54  ;;  %v685_v11 = vpop.f32.mrf.mxu1 }
 0x160   : > { %v693_v12 = vadd.f32 %v685_v11, %v583_v56  ;;  %v646_v59 = vpop.f32.mrf.mxu0 }
 0x161   : > { %v692_v13 = vadd.f32 %v646_v59, %v582_v57  ;;  %v3335_v7 = vpop.f32.mrf.mxu1 }
 0x162   : > { %v648_v14 = vpop.f32.mrf.mxu0 }
 0x163   : > { %v688_v15 = vpop.f32.mrf.mxu1 }
 0x164   : > { %v649_v16 = vpop.f32.mrf.mxu0 }
 0x165   : > { %v3336_v17 = vpop.f32.mrf.mxu1 }
 0x166   : > { %v754_v18 = vpop.f32.mrf.mxu0 }
 0x167   : > { %v801_v19 = vadd.f32 %v754_v18, %v691_v2  ;;  %v795_v4 = vpop.f32.mrf.mxu1 }
 0x168   : > { %v803_v20 = vadd.f32 %v795_v4, %v693_v12  ;;  %v756_v21 = vpop.f32.mrf.mxu0 }
 0x169   : > { %v802_v22 = vadd.f32 %v756_v21, %v692_v13  ;;  %v3341_v23 = vpop.f32.mrf.mxu1 }
 0x16a   : > { %v758_v24 = vpop.f32.mrf.mxu0 }
 0x16b   : > { %v798_v25 = vpop.f32.mrf.mxu1 }
 0x16c   : > { %v759_v26 = vpop.f32.mrf.mxu0 }
 0x16d   : > { %v3342_v27 = vpop.f32.mrf.mxu1 }
 0x16e   : > { %v864_v28 = vpop.f32.mrf.mxu0 }
 0x16f   : > { %v911_v0 = vadd.f32 %v864_v28, %v801_v19  ;;  %v905_v1 = vpop.f32.mrf.mxu1 }
 0x170   : > { %v913_v29 = vadd.f32 %v905_v1, %v803_v20  ;;  %v866_v30 = vpop.f32.mrf.mxu0 }
 0x171   : > { %v912_v31 = vadd.f32 %v866_v30, %v802_v22  ;;  %v3347_v32 = vpop.f32.mrf.mxu1 }
 0x172   : > { %v868_v33 = vpop.f32.mrf.mxu0 }
 0x173   : > { %v908_v34 = vpop.f32.mrf.mxu1 }
 0x174   : > { %v869_v35 = vpop.f32.mrf.mxu0 }
 0x175   : > { %v3348_v36 = vpop.f32.mrf.mxu1 }
 0x176   : > { %v974_v37 = vpop.f32.mrf.mxu0 }
 0x177   : > { %v1021_v38 = vadd.f32 %v974_v37, %v911_v0  ;;  %v1015_v39 = vpop.f32.mrf.mxu1 }
 0x178   : > { %v1023_v40 = vadd.f32 %v1015_v39, %v913_v29  ;;  %v976_v41 = vpop.f32.mrf.mxu0 }
 0x179   : > { %v1022_v42 = vadd.f32 %v976_v41, %v912_v31  ;;  %v3353_v43 = vpop.f32.mrf.mxu1 }
 0x17a   : > { %v978_v44 = vpop.f32.mrf.mxu0 }
 0x17b   : > { %v1018_v45 = vpop.f32.mrf.mxu1 }
 0x17c   : > { %v979_v46 = vpop.f32.mrf.mxu0 }
 0x17d   : > { %v3354_v47 = vpop.f32.mrf.mxu1 }
 0x17e   : > { %v1084_v48 = vpop.f32.mrf.mxu0 }
 0x17f   : > { %v1131_v49 = vadd.f32 %v1084_v48, %v1021_v38  ;;  %v1125_v50 = vpop.f32.mrf.mxu1 }
 0x180   : > { %v1133_v51 = vadd.f32 %v1125_v50, %v1023_v40  ;;  %v1086_v6 = vpop.f32.mrf.mxu0 }
 0x181   : > { %v1132_v8 = vadd.f32 %v1086_v6, %v1022_v42  ;;  %v3359_v52 = vpop.f32.mrf.mxu1 }
 0x182   : > { %v1088_v53 = vpop.f32.mrf.mxu0 }
 0x183   : > { %v1128_v54 = vpop.f32.mrf.mxu1 }
 0x184   : > { %v1089_v9 = vpop.f32.mrf.mxu0 }
 0x185   : > { %v3360_v5 = vpop.f32.mrf.mxu1 }
 0x186   : > { %v1194_v55 = vpop.f32.mrf.mxu0 }
 0x187   : > { %v1241_v3 = vadd.f32 %v1194_v55, %v1131_v49  ;;  %v1235_v56 = vpop.f32.mrf.mxu1 }
 0x188   : > { %v1243_v57 = vadd.f32 %v1235_v56, %v1133_v51  ;;  %v1196_v58 = vpop.f32.mrf.mxu0 }
 0x189   : > { %v1242_v60 = vadd.f32 %v1196_v58, %v1132_v8  ;;  %v3365_v61 = vpop.f32.mrf.mxu1 }
 0x18a   : > { %v1198_v62 = vpop.f32.mrf.mxu0 }
 0x18b   : > { %v1238_v63 = vpop.f32.mrf.mxu1 }
 0x18c   : > { %v1199_v10 = vpop.f32.mrf.mxu0 }
 0x18d   : > { %v3366_v2 = vpop.f32.mrf.mxu1 }
 0x18e   : > { %v1304_v11 = vpop.f32.mrf.mxu0 }
 0x18f   : > { %v1351_v12 = vadd.f32 %v1304_v11, %v1241_v3  ;;  %v1345_v59 = vpop.f32.mrf.mxu1 }
 0x190   : > { %v1353_v13 = vadd.f32 %v1345_v59, %v1243_v57  ;;  %v1306_v7 = vpop.f32.mrf.mxu0 }
 0x191   : > { %v1352_v14 = vadd.f32 %v1306_v7, %v1242_v60  ;;  %v3371_v15 = vpop.f32.mrf.mxu1 }
 0x192   : > { %v1308_v16 = vpop.f32.mrf.mxu0 }
 0x193   : > { %v1348_v17 = vpop.f32.mrf.mxu1 }
 0x194   : > { %v1309_v18 = vpop.f32.mrf.mxu0 }
 0x195   : > { %v3372_v19 = vpop.f32.mrf.mxu1 }
 0x196   : > { %v1414_v4 = vpop.f32.mrf.mxu0 }
 0x197   : > { %v1461_v20 = vadd.f32 %v1414_v4, %v1351_v12  ;;  %v1455_v21 = vpop.f32.mrf.mxu1 }
 0x198   : > { %v1463_v22 = vadd.f32 %v1455_v21, %v1353_v13  ;;  %v1416_v23 = vpop.f32.mrf.mxu0 }
 0x199   : > { %v1462_v24 = vadd.f32 %v1416_v23, %v1352_v14  ;;  %v3377_v25 = vpop.f32.mrf.mxu1 }
 0x19a   : > { %v1418_v26 = vpop.f32.mrf.mxu0 }
 0x19b   : > { %v1458_v27 = vpop.f32.mrf.mxu1 }
 0x19c   : > { %v1419_v28 = vpop.f32.mrf.mxu0 }
 0x19d   : > { %v3378_v0 = vpop.f32.mrf.mxu1 }
 0x19e   : > { %v1524_v1 = vpop.f32.mrf.mxu0 }
 0x19f   : > { %v1571_v29 = vadd.f32 %v1524_v1, %v1461_v20  ;;  %v1565_v30 = vpop.f32.mrf.mxu1 }
 0x1a0   : > { %v1573_v31 = vadd.f32 %v1565_v30, %v1463_v22  ;;  %v1526_v32 = vpop.f32.mrf.mxu0 }
 0x1a1   : > { %v1572_v33 = vadd.f32 %v1526_v32, %v1462_v24  ;;  %v3383_v34 = vpop.f32.mrf.mxu1 }
 0x1a2   : > { %v1528_v35 = vpop.f32.mrf.mxu0 }
 0x1a3   : > { %v1568_v36 = vpop.f32.mrf.mxu1 }
 0x1a4   : > { %v1529_v37 = vpop.f32.mrf.mxu0 }
 0x1a5   : > { %v3384_v38 = vpop.f32.mrf.mxu1 }
 0x1a6   : > { %v1634_v39 = vpop.f32.mrf.mxu0 }
 0x1a7   : > { %v1681_v40 = vadd.f32 %v1634_v39, %v1571_v29  ;;  %v1675_v41 = vpop.f32.mrf.mxu1 }
 0x1a8   : > { %v1683_v42 = vadd.f32 %v1675_v41, %v1573_v31  ;;  %v1636_v43 = vpop.f32.mrf.mxu0 }
 0x1a9   : > { %v1682_v44 = vadd.f32 %v1636_v43, %v1572_v33  ;;  %v3389_v45 = vpop.f32.mrf.mxu1 }
 0x1aa   : > { %v1638_v46 = vpop.f32.mrf.mxu0 }
 0x1ab   : > { %v1678_v47 = vpop.f32.mrf.mxu1 }
 0x1ac   : > { %v1639_v48 = vpop.f32.mrf.mxu0 }
 0x1ad   : > { %v3390_v49 = vpop.f32.mrf.mxu1 }
 0x1ae   : > { %v1744_v50 = vpop.f32.mrf.mxu0 }
 0x1af   : > { %v4048_v51 = vadd.f32 %v1744_v50, %v1681_v40  ;;  %v1785_v6 = vpop.f32.mrf.mxu1 }
 0x1b0   : > { %v4050_v8 = vadd.f32 %v1785_v6, %v1683_v42  ;;  %v1746_v52 = vpop.f32.mrf.mxu0 }
 0x1b1   : > { %v4052_v53 = vadd.f32 %v1746_v52, %v1682_v44  ;;  %v3395_v54 = vpop.f32.mrf.mxu1 }
 0x1b2   : > { %v1748_v9 = vpop.f32.mrf.mxu0 }
 0x1b3   : > { %v1788_v5 = vpop.f32.mrf.mxu1 }
 0x1b4   : > { %v1749_v55 = vpop.f32.mrf.mxu0 }
 0x1b5   : > { %v3396_v3 = vpop.f32.mrf.mxu1 }
 0x1b6   : > { %v1854_v56 = vpop.f32.mrf.mxu0 }
 0x1b7   : > { %v1895_v57 = vpop.f32.mrf.mxu1 }
 0x1b8   : > { %v4054_v58 = vpop.f32.mrf.mxu0 }
 0x1b9   : > { %v3401_v60 = vpop.f32.mrf.mxu1 }
 0x1ba   : > { %v1858_v61 = vpop.f32.mrf.mxu0  ;;  %v1901_v60 = vadd.f32 %v1854_v56, %v4048_v51 }
 0x1bb   : > { %v1898_v62 = vpop.f32.mrf.mxu1 }
 0x1bc   : > { %v1859_v63 = vpop.f32.mrf.mxu0  ;;  %v1903_v62 = vadd.f32 %v1895_v57, %v4050_v8 }
 0x1bd   : > { %v3402_v10 = vpop.f32.mrf.mxu1 }
 0x1be   : > { %v1964_v2 = vpop.f32.mrf.mxu0  ;;  %v1902_v10 = vadd.f32 %v4054_v58, %v4052_v53 }
 0x1bf   : > { %v2005_v11 = vpop.f32.mrf.mxu1 }
 0x1c0   : > { %v1966_v12 = vpop.f32.mrf.mxu0 }
 0x1c1   : > { %v3407_v59 = vpop.f32.mrf.mxu1 }
 0x1c2   : > { %v1968_v13 = vpop.f32.mrf.mxu0  ;;  %v2011_v59 = vadd.f32 %v1964_v2, %v1901_v60 }
 0x1c3   : > { %v2008_v7 = vpop.f32.mrf.mxu1 }
 0x1c4   : > { %v1969_v14 = vpop.f32.mrf.mxu0  ;;  %v2013_v7 = vadd.f32 %v2005_v11, %v1903_v62 }
 0x1c5   : > { %v3408_v15 = vpop.f32.mrf.mxu1 }
 0x1c6   : > { %v2074_v16 = vpop.f32.mrf.mxu0  ;;  %v2012_v15 = vadd.f32 %v1966_v12, %v1902_v10 }
 0x1c7   : > { %v2115_v17 = vpop.f32.mrf.mxu1 }
 0x1c8   : > { %v2076_v18 = vpop.f32.mrf.mxu0 }
 0x1c9   : > { %v3413_v19 = vpop.f32.mrf.mxu1 }
 0x1ca   : > { %v2078_v4 = vpop.f32.mrf.mxu0  ;;  %v2121_v19 = vadd.f32 %v2074_v16, %v2011_v59 }
 0x1cb   : > { %v2118_v20 = vpop.f32.mrf.mxu1 }
 0x1cc   : > { %v2079_v21 = vpop.f32.mrf.mxu0  ;;  %v2123_v20 = vadd.f32 %v2115_v17, %v2013_v7 }
 0x1cd   : > { %v3414_v22 = vpop.f32.mrf.mxu1 }
 0x1ce   : > { %v2184_v23 = vpop.f32.mrf.mxu0  ;;  %v2122_v22 = vadd.f32 %v2076_v18, %v2012_v15 }
 0x1cf   : > { %v2225_v24 = vpop.f32.mrf.mxu1 }
 0x1d0   : > { %v2186_v25 = vpop.f32.mrf.mxu0  ;;  %v2233_v51 = vadd.f32 %v2225_v24, %v2123_v20 }
 0x1d1   : > { %v3419_v26 = vpop.f32.mrf.mxu1 }
 0x1d2   : > { %v2188_v27 = vpop.f32.mrf.mxu0  ;;  %v2231_v26 = vadd.f32 %v2184_v23, %v2121_v19 }
 0x1d3   : > { %v2228_v28 = vpop.f32.mrf.mxu1 }
 0x1d4   : > { %v2189_v0 = vpop.f32.mrf.mxu0  ;;  %v2232_v28 = vadd.f32 %v2186_v25, %v2122_v22 }
 0x1d5   : > { %v3420_v1 = vpop.f32.mrf.mxu1 }
 0x1d6   : > { %v2294_v29 = vpop.f32.mrf.mxu0 }
 0x1d7   : > { %v2335_v30 = vpop.f32.mrf.mxu1  ;;  %v2341_v8 = vadd.f32 %v2294_v29, %v2231_v26 }
 0x1d8   : > { %v2296_v31 = vpop.f32.mrf.mxu0  ;;  %v2343_v0 = vadd.f32 %v2335_v30, %v2233_v51 }
 0x1d9   : > { %v3425_v32 = vpop.f32.mrf.mxu1  ;;  %v2342_v53 = vadd.f32 %v2296_v31, %v2232_v28 }
 0x1da   : > { %v2298_v33 = vpop.f32.mrf.mxu0 }
 0x1db   : > { %v2338_v34 = vpop.f32.mrf.mxu1 }
 0x1dc   : > { %v2299_v35 = vpop.f32.mrf.mxu0 }
 0x1dd   : > { %v3426_v36 = vpop.f32.mrf.mxu1 }
 0x1de   : > { %v2404_v37 = vpop.f32.mrf.mxu0 }
 0x1df   : > { %v2445_v38 = vpop.f32.mrf.mxu1  ;;  %v2451_v58 = vadd.f32 %v2404_v37, %v2341_v8 }
 0x1e0   : > { %v2406_v39 = vpop.f32.mrf.mxu0  ;;  %v2453_v11 = vadd.f32 %v2445_v38, %v2343_v0 }
 0x1e1   : > { %v3431_v40 = vpop.f32.mrf.mxu1  ;;  %v2452_v12 = vadd.f32 %v2406_v39, %v2342_v53 }
 0x1e2   : > { %v2408_v41 = vpop.f32.mrf.mxu0 }
 0x1e3   : > { %v2448_v42 = vpop.f32.mrf.mxu1 }
 0x1e4   : > { %v2409_v43 = vpop.f32.mrf.mxu0 }
 0x1e5   : > { %v3432_v44 = vpop.f32.mrf.mxu1 }
 0x1e6   : > { %v2514_v45 = vpop.f32.mrf.mxu0 }
 0x1e7   : > { %v2555_v46 = vpop.f32.mrf.mxu1  ;;  %v2561_v16 = vadd.f32 %v2514_v45, %v2451_v58 }
 0x1e8   : > { %v2516_v47 = vpop.f32.mrf.mxu0  ;;  %v2563_v17 = vadd.f32 %v2555_v46, %v2453_v11 }
 0x1e9   : > { %v3437_v48 = vpop.f32.mrf.mxu1  ;;  %v2562_v18 = vadd.f32 %v2516_v47, %v2452_v12 }
 0x1ea   : > { %v2518_v49 = vpop.f32.mrf.mxu0 }
 0x1eb   : > { %v2558_v50 = vpop.f32.mrf.mxu1 }
 0x1ec   : > { %v2519_v6 = vpop.f32.mrf.mxu0 }
 0x1ed   : > { %v3438_v52 = vpop.f32.mrf.mxu1 }
 0x1ee   : > { %v2624_v54 = vpop.f32.mrf.mxu0 }
 0x1ef   : > { %v2665_v9 = vpop.f32.mrf.mxu1  ;;  %v2671_v23 = vadd.f32 %v2624_v54, %v2561_v16 }
 0x1f0   : > { %v2626_v5 = vpop.f32.mrf.mxu0  ;;  %v2673_v24 = vadd.f32 %v2665_v9, %v2563_v17 }
 0x1f1   : > { %v3443_v55 = vpop.f32.mrf.mxu1  ;;  %v2672_v25 = vadd.f32 %v2626_v5, %v2562_v18 }
 0x1f2   : > { %v2628_v3 = vpop.f32.mrf.mxu0 }
 0x1f3   : > { %v2668_v61 = vpop.f32.mrf.mxu1 }
 0x1f4   : > { %v2629_v63 = vpop.f32.mrf.mxu0 }
 0x1f5   : > { %v3444_v13 = vpop.f32.mrf.mxu1 }
 0x1f6   : > { %v2734_v14 = vpop.f32.mrf.mxu0 }
 0x1f7   : > { %v2775_v4 = vpop.f32.mrf.mxu1  ;;  %v2781_v29 = vadd.f32 %v2734_v14, %v2671_v23 }
 0x1f8   : > { %v2736_v21 = vpop.f32.mrf.mxu0  ;;  %v2783_v30 = vadd.f32 %v2775_v4, %v2673_v24 }
 0x1f9   : > { %v3449_v27 = vpop.f32.mrf.mxu1  ;;  %v2782_v31 = vadd.f32 %v2736_v21, %v2672_v25 }
 0x1fa   : > { %v2738_v56 = vpop.f32.mrf.mxu0 }
 0x1fb   : > { %v2778_v57 = vpop.f32.mrf.mxu1 }
 0x1fc   : > { %v2739_v1 = vpop.f32.mrf.mxu0 }
 0x1fd   : > { %v3450_v2 = vpop.f32.mrf.mxu1 }
 0x1fe   : > { %v2844_v32 = vpop.f32.mrf.mxu0 }
 0x1ff   : > { %v2885_v33 = vpop.f32.mrf.mxu1  ;;  %v2891_v37 = vadd.f32 %v2844_v32, %v2781_v29 }
 0x200   : > { %v2846_v34 = vpop.f32.mrf.mxu0  ;;  %v2893_v38 = vadd.f32 %v2885_v33, %v2783_v30 }
 0x201   : > { %v3455_v35 = vpop.f32.mrf.mxu1  ;;  %v2892_v39 = vadd.f32 %v2846_v34, %v2782_v31 }
 0x202   : > { %v2848_v36 = vpop.f32.mrf.mxu0 }
 0x203   : > { %v2888_v40 = vpop.f32.mrf.mxu1 }
 0x204   : > { %v2849_v41 = vpop.f32.mrf.mxu0 }
 0x205   : > { %v3456_v42 = vpop.f32.mrf.mxu1 }
 0x206   : > { %v2954_v43 = vpop.f32.mrf.mxu0 }
 0x207   : > { %v4060_v44 = vadd.f32 %v2954_v43, %v2891_v37  ;;  %v2995_v45 = vpop.f32.mrf.mxu1 }
 0x208   : > { %v4062_v46 = vadd.f32 %v2995_v45, %v2893_v38  ;;  %v2956_v47 = vpop.f32.mrf.mxu0 }
 0x209   : > { %v4065_v48 = vmul.f32 0.70710677, %v4060_v44  ;;  %v4067_v49 = vadd.f32 %v2956_v47, %v2892_v39  ;;  %v3461_v50 = vpop.f32.mrf.mxu1 }
 0x20a   : > { %v4070_v6 = vmul.f32 0.70710677, %v4062_v46  ;;  %v2958_v52 = vpop.f32.mrf.mxu0 }
 0x20b   : > { %v3013_v54 = vand.u32 2147483647, %v4065_v48  ;;  %v4074_v9 = vmul.f32 0.70710677, %v4067_v49  ;;  %v2998_v5 = vpop.f32.mrf.mxu1  ;;  %vm3007_vm0 = vcmp.ge.f32.partialorder %v4065_v48, 0.0  ;;  %v3548_v52 = vmov -1.0  }
 0x20c   : > { %v3015_v55 = vand.u32 2147483647, %v4070_v6  ;;  %v2959_v3 = vpop.f32.mrf.mxu0  ;;  %vm3009_vm1 = vcmp.ge.f32.partialorder %v4070_v6, 0.0  ;;  %v3073_v48 = vmul.f32 0.5, %v4060_v44  ;;  %v3075_v6 = vmul.f32 0.5, %v4062_v46 }
 0x20d   : > { %v3016_v60 = vmul.f32 0.3275911, %v3013_v54  ;;  %v3462_v61 = vpop.f32.mrf.mxu1  ;;  %v3014_v63 = vand.u32 2147483647, %v4074_v9  ;;  %v3052_v14 = vsub.f32 0.0, %v3013_v54  ;;  %v3012_v3 = vsel %vm3009_vm1, 1.0, %v3548_v52 }
 0x20e   : > { %v3018_v62 = vmul.f32 0.3275911, %v3015_v55  ;;  %v3054_v15 = vsub.f32 0.0, %v3015_v55  ;;  %vm3008_vm2 = vcmp.ge.f32.partialorder %v4074_v9, 0.0  ;;  %v3074_v9 = vmul.f32 0.5, %v4067_v49 }
 0x20f   : > { %v3019_v10 = vadd.f32 1.0, %v3016_v60  ;;  %v3017_v13 = vmul.f32 0.3275911, %v3014_v63  ;;  %v3055_v19 = vmul.f32 %v3052_v14, %v3013_v54  ;;  %v3053_v4 = vsub.f32 0.0, %v3014_v63 }
 0x210   : > { %v3021_v59 = vadd.f32 1.0, %v3018_v62  ;;  %v3057_v20 = vmul.f32 %v3054_v15, %v3015_v55  ;;  %v3010_v54 = vsel %vm3007_vm0, 1.0, %v3548_v52 }
 0x211   : > { %3501 = vrcp.f32 %v3019_v10  ;;  %v3020_v7 = vadd.f32 1.0, %v3017_v13  ;;  %v3058_v27 = vmul.f32 1.442695, %v3055_v19  ;;  %v3056_v51 = vmul.f32 %v3053_v4, %v3014_v63 }
 0x212   : > { %3503 = vrcp.f32 %v3021_v59  ;;  %v3062_v28 = vmul.f32 1.442695, %v3057_v20  ;;  %v3011_v59 = vsel %vm3008_vm2, 1.0, %v3548_v52 }
 0x213   : > { %3505 = vrcp.f32 %v3020_v7  ;;  %v3060_v58 = vmul.f32 1.442695, %v3056_v51 }
 0x214   : > { %3507 = vpow2.f32 %v3058_v27 }
 0x215   : > { %3509 = vpow2.f32 %v3062_v28 }
 0x216   : > { %3511 = vpow2.f32 %v3060_v58 }
 0x21e   : > { %v3502_v21 = vpop.eup %3501 }
 0x21f   : > { %v3504_v22 = vpop.eup %3503  ;;  %v3025_v26 = vmul.f32 1.0614054, %v3502_v21 }
 0x220   : > { %v3027_v56 = vmul.f32 1.0614054, %v3504_v22  ;;  %v3506_v57 = vpop.eup %3505 }
 0x221   : > { %v3028_v8 = vadd.f32 -1.4531521, %v3025_v26  ;;  %v3026_v53 = vmul.f32 1.0614054, %v3506_v57  ;;  %v3508_v31 = vpop.eup %3507 }
 0x222   : > { %v3030_v0 = vadd.f32 -1.4531521, %v3027_v56  ;;  %v3510_v42 = vpop.eup %3509 }
 0x223   : > { %v3031_v1 = vmul.f32 %v3502_v21, %v3028_v8  ;;  %v3029_v32 = vadd.f32 -1.4531521, %v3026_v53  ;;  %v3512_v50 = vpop.eup %3511 }
 0x224   : > { %v3033_v2 = vmul.f32 %v3504_v22, %v3030_v0 }
 0x225   : > { %v3034_v11 = vadd.f32 1.4214138, %v3031_v1  ;;  %v3032_v33 = vmul.f32 %v3506_v57, %v3029_v32 }
 0x226   : > { %v3036_v12 = vadd.f32 1.4214138, %v3033_v2 }
 0x227   : > { %v3037_v16 = vmul.f32 %v3502_v21, %v3034_v11  ;;  %v3035_v18 = vadd.f32 1.4214138, %v3032_v33 }
 0x228   : > { %v3039_v17 = vmul.f32 %v3504_v22, %v3036_v12 }
 0x229   : > { %v3040_v34 = vadd.f32 -0.28449672, %v3037_v16  ;;  %v3038_v24 = vmul.f32 %v3506_v57, %v3035_v18 }
 0x22a   : > { %v3042_v23 = vadd.f32 -0.28449672, %v3039_v17 }
 0x22b   : > { %v3043_v35 = vmul.f32 %v3502_v21, %v3040_v34  ;;  %v3041_v29 = vadd.f32 -0.28449672, %v3038_v24 }
 0x22c   : > { %v3045_v36 = vmul.f32 %v3504_v22, %v3042_v23 }
 0x22d   : > { %v3046_v25 = vadd.f32 0.2548296, %v3043_v35  ;;  %v3044_v41 = vmul.f32 %v3506_v57, %v3041_v29 }
 0x22e   : > { %v3048_v40 = vadd.f32 0.2548296, %v3045_v36 }
 0x22f   : > { %v3049_v30 = vmul.f32 %v3502_v21, %v3046_v25  ;;  %v3047_v43 = vadd.f32 0.2548296, %v3044_v41 }
 0x230   : > { %v3051_v37 = vmul.f32 %v3504_v22, %v3048_v40 }
 0x231   : > { %v3064_v38 = vmul.f32 %v3508_v31, %v3049_v30  ;;  %v3050_v47 = vmul.f32 %v3506_v57, %v3047_v43 }
 0x232   : > { %v3066_v39 = vmul.f32 %v3510_v42, %v3051_v37 }
 0x233   : > { %v3067_v45 = vsub.f32 1.0, %v3064_v38  ;;  %v3065_v60 = vmul.f32 %v3512_v50, %v3050_v47 }
 0x234   : > { %v3069_v5 = vsub.f32 1.0, %v3066_v39 }
 0x235   : > { %v3070_v55 = vmul.f32 %v3067_v45, %v3010_v54  ;;  %v3068_v63 = vsub.f32 1.0, %v3065_v60 }
 0x236   : > { %v3072_v61 = vmul.f32 %v3069_v5, %v3012_v3 }
 0x237   : > { %v3076_v62 = vadd.f32 1.0, %v3070_v55  ;;  %v3071_v7 = vmul.f32 %v3068_v63, %v3011_v59 }
 0x238   : > { %v3078_v10 = vadd.f32 1.0, %v3072_v61 }
 0x239   : > { %v3079_v13 = vmul.f32 %v3076_v62, %v3073_v48  ;;  %v3077_v15 = vadd.f32 1.0, %v3071_v7 }
 0x23a   : > { %v3081_v14 = vmul.f32 %v3078_v10, %v3075_v6 }
 0x23b   : > { %3082 = vst [vmem:[%s217_s5] sm:$0xff] %v3079_v13  ;;  %v3080_v44 = vmul.f32 %v3077_v15, %v3074_v9 }
 0x23c   : > { %3084 = vst [vmem:[%s217_s5 + $0x10] sm:$0xff] %v3081_v14 }
 0x23d   : > { %3083 = vst [vmem:[%s217_s5 + $0x8] sm:$0xff] %v3080_v44 }
 0x23e PF: > { %s14_s15 = sadd.s32 1, %s3519_s15  }
 0x23f   : > { %p11_p4 = scmp.ge.s32.totalorder %s14_s15, 4  }
 0x241   :  { %13 = sbr.rel (!%p11_p4) target bundleno = 1 (0x1), region = 93 }

</bundles_post_ra>
